<compile_context>
chip_gen: v5e
topology: v5e:2x2
jax: 0.10.0
libtpu: 0.0.40
codegen_flags: <defaults>
</compile_context>

<pallas_src>
import functools
import numpy as np
import jax
import jax.numpy as jnp
from jax.experimental import pallas as pl
from jax.experimental.pallas import tpu as pltpu

# ----------------------------- config (mirrors args) -----------------------------
FOLD_DIM = 32
FOLD_PAD = 128          # lane-dense padded width for all FOLD_DIM activations
VIRTUAL_NUM = 3
TOP_K = 5               # args.k_neighbors
NUM_RBF = 16
NODE_DIST = NODE_ANGLE = NODE_DIRECT = True
EDGE_DIST = EDGE_ANGLE = EDGE_DIRECT = True
BN_EPS = 1e-5
LRELU_SLOPE = 0.01
ROW_TILE_CAP = 2048     # ~2 MiB bf16 input block at 512-wide; far under VMEM limits

NODE_IN = 0
if NODE_DIST:
    _pair = 6
    if VIRTUAL_NUM > 0:
        _pair += VIRTUAL_NUM * (VIRTUAL_NUM - 1)
    NODE_IN += _pair * NUM_RBF
if NODE_ANGLE:
    NODE_IN += 12
if NODE_DIRECT:
    NODE_IN += 9

EDGE_IN = 0
if EDGE_DIST:
    _pair = 16
    if VIRTUAL_NUM > 0:
        _pair += VIRTUAL_NUM + VIRTUAL_NUM * (VIRTUAL_NUM - 1)
    EDGE_IN += _pair * NUM_RBF
if EDGE_ANGLE:
    EDGE_IN += 4
if EDGE_DIRECT:
    EDGE_IN += 12


def _round_up(x, m):
    return ((x + m - 1) // m) * m


def _cdiv(a, b):
    return -(-a // b)


# ----------------------------- geometric feature glue (plain JAX) ----------------
def _normalize(x, axis=-1):
    n = jnp.linalg.norm(x, axis=axis, keepdims=True)
    return jnp.nan_to_num(x / n)


def _rbf(D, num_rbf=NUM_RBF):
    D_mu = jnp.linspace(0.0, 20.0, num_rbf).reshape(1, 1, 1, -1)
    D_sigma = 20.0 / num_rbf
    return jnp.exp(-(((D[..., None] - D_mu) / D_sigma) ** 2))


def gather_nodes(nodes, idx):
    # nodes [B,N,C], idx [B,N,K] -> [B,N,K,C]
    B, N, K = idx.shape
    flat = idx.reshape(B, N * K)
    out = jnp.take_along_axis(nodes, flat[..., None], axis=1)
    return out.reshape(B, N, K, nodes.shape[-1])


def _node_rbf(A, Bm):
    # same-residue distance RBF (matches the E_idx=None branch of the reference)
    D = jnp.sqrt(jnp.sum((A[:, :, None, :] - Bm[:, :, None, :]) ** 2, -1) + 1e-6)  # [B,N,1]
    return _rbf(D)[:, :, 0, :]                                                     # [B,N,16]


def _dihedrals(X, eps=1e-7):
    B, N = X.shape[0], X.shape[1]
    Xr = X[:, :, :3, :].reshape(B, 3 * N, 3)
    dX = Xr[:, 1:, :] - Xr[:, :-1, :]
    U = _normalize(dX, -1)
    u_2, u_1, u_0 = U[:, :-2, :], U[:, 1:-1, :], U[:, 2:, :]
    n_2 = _normalize(jnp.cross(u_2, u_1), -1)
    n_1 = _normalize(jnp.cross(u_1, u_0), -1)
    cosD = jnp.clip(jnp.sum(n_2 * n_1, -1), -1 + eps, 1 - eps)
    D = jnp.sign(jnp.sum(u_2 * n_1, -1)) * jnp.arccos(cosD)
    D = jnp.pad(D, ((0, 0), (1, 2))).reshape(B, N, 3)
    dih = jnp.concatenate([jnp.cos(D), jnp.sin(D)], -1)
    cosA = jnp.clip(jnp.sum(u_2 * u_1, -1), -1 + eps, 1 - eps)
    A = jnp.pad(jnp.arccos(cosA), ((0, 0), (1, 2))).reshape(B, N, 3)
    ang = jnp.concatenate([jnp.cos(A), jnp.sin(A)], -1)
    return jnp.concatenate([dih, ang], -1)  # [B,N,12]


def _quaternions(R):
    diag = jnp.diagonal(R, axis1=-2, axis2=-1)
    Rxx, Ryy, Rzz = diag[..., 0], diag[..., 1], diag[..., 2]
    mags = 0.5 * jnp.sqrt(jnp.abs(1 + jnp.stack(
        [Rxx - Ryy - Rzz, -Rxx + Ryy - Rzz, -Rxx - Ryy + Rzz], -1)))
    signs = jnp.sign(jnp.stack(
        [R[..., 2, 1] - R[..., 1, 2], R[..., 0, 2] - R[..., 2, 0], R[..., 1, 0] - R[..., 0, 1]], -1))
    xyz = signs * mags
    w = jnp.sqrt(jax.nn.relu(1 + Rxx + Ryy + Rzz))[..., None] / 2.0
    Q = jnp.concatenate([xyz, w], -1)
    return Q / jnp.maximum(jnp.linalg.norm(Q, axis=-1, keepdims=True), 1e-12)


def _orientations_coarse_gl_tuple(Xfull, E_idx):
    V = Xfull
    B, N = Xfull.shape[0], Xfull.shape[1]
    K = E_idx.shape[-1]
    X = Xfull[:, :, :3, :].reshape(B, 3 * N, 3)
    dX = X[:, 1:, :] - X[:, :-1, :]
    U = _normalize(dX, -1)
    u_0, u_1 = U[:, :-2, :], U[:, 1:-1, :]
    n_0 = _normalize(jnp.cross(u_0, u_1), -1)[:, ::3, :]
    b_1 = _normalize(u_0 - u_1, -1)[:, ::3, :]
    Xca = X[:, ::3, :]
    Q = jnp.stack([b_1, n_0, jnp.cross(b_1, n_0)], 2).reshape(B, N - 1, 9)
    Q = jnp.pad(Q, ((0, 0), (0, 1), (0, 0)))  # [B,N,9]
    Q_neighbors = gather_nodes(Q, E_idx)
    X_neighbors = gather_nodes(V[:, :, 1, :], E_idx)
    N_neighbors = gather_nodes(V[:, :, 0, :], E_idx)
    C_neighbors = gather_nodes(V[:, :, 2, :], E_idx)
    O_neighbors = gather_nodes(V[:, :, 3, :], E_idx)
    Qm = Q.reshape(B, N, 3, 3)[:, :, None]                    # [B,N,1,3,3]
    Qn = Q_neighbors.reshape(B, N, K, 3, 3)
    dX4 = jnp.stack([X_neighbors, N_neighbors, C_neighbors, O_neighbors], 3) \
        - Xca[:, :, None, None, :]                            # [B,N,K,4,3]
    dU = jnp.matmul(Qm[:, :, :, None], dX4[..., None])[..., 0]  # [B,N,K,4,3]
    E_direct = _normalize(dU, -1).reshape(B, N, K, 12)
    R = jnp.matmul(jnp.swapaxes(Qm, -1, -2), Qn)              # [B,N,K,3,3]
    q = _quaternions(R)                                       # [B,N,K,4]
    dX_inner = V[:, :, jnp.array([0, 2, 3]), :] - Xca[:, :, None, :]
    dU_inner = jnp.matmul(Qm, dX_inner[..., None])[..., 0]    # [B,N,3,3]
    V_direct = _normalize(dU_inner, -1).reshape(B, N, 9)
    return V_direct, E_direct, q


def _full_dist(X, mask, top_k, eps=1e-6):
    mask_2D = mask[:, None, :] * mask[:, :, None]
    dX = X[:, None, :, :] - X[:, :, None, :]
    D = (1.0 - mask_2D) * 10000 + mask_2D * jnp.sqrt(jnp.sum(dX ** 2, 3) + eps)
    D_max = jnp.max(D, -1, keepdims=True)
    D_adjust = D + (1.0 - mask_2D) * (D_max + 1)
    k = min(top_k, D_adjust.shape[-1])
    neg_vals, idx = jax.lax.top_k(-D_adjust, k)
    return -neg_vals, idx


def compute_features(X, mask, virtual_atoms, top_k):
    B, N = X.shape[0], X.shape[1]
    X_ca = X[:, :, 1, :]
    _, E_idx = _full_dist(X_ca, mask, top_k)
    K = E_idx.shape[-1]

    V_angles = _dihedrals(X)                                        # [B,N,12]
    V_direct, E_direct, E_angles = _orientations_coarse_gl_tuple(X, E_idx)

    atom_N, atom_Ca, atom_C, atom_O = X[:, :, 0], X[:, :, 1], X[:, :, 2], X[:, :, 3]
    b = atom_Ca - atom_N
    c = atom_C - atom_Ca
    a = jnp.cross(b, c)

    atoms = {'N': atom_N, 'Ca': atom_Ca, 'C': atom_C, 'O': atom_O}
    va = virtual_atoms / jnp.linalg.norm(virtual_atoms, axis=1, keepdims=True)
    for i in range(VIRTUAL_NUM):
        atoms['v%d' % i] = va[i, 0] * a + va[i, 1] * b + va[i, 2] * c + atom_Ca

    # --- node (same-residue) RBFs, O(N) ---
    node_pairs = ['Ca-N', 'Ca-C', 'Ca-O', 'N-C', 'N-O', 'O-C']
    node_dist = []
    for pr in node_pairs:
        a1, a2 = pr.split('-')
        node_dist.append(_node_rbf(atoms[a1], atoms[a2]))
    for i in range(VIRTUAL_NUM):
        for j in range(i):
            node_dist.append(_node_rbf(atoms['v%d' % i], atoms['v%d' % j]))
            node_dist.append(_node_rbf(atoms['v%d' % j], atoms['v%d' % i]))
    V_dist = jnp.concatenate(node_dist, axis=-1)

    # --- edge RBFs on gathered K-neighbor coordinates: O(N*K), not O(N^2) ---
    order = ['N', 'Ca', 'C', 'O'] + ['v%d' % i for i in range(VIRTUAL_NUM)]
    pos_of = {k: i for i, k in enumerate(order)}
    atom_stack = jnp.stack([atoms[k] for k in order], axis=2)          # [B,N,7,3]
    nb = gather_nodes(atom_stack.reshape(B, N, -1), E_idx)             # [B,N,K,21]
    nb = nb.reshape(B, N, K, len(order), 3)

    def edge_rbf(a1, a2):
        d = jnp.sqrt(jnp.sum((atoms[a1][:, :, None, :]
                              - nb[:, :, :, pos_of[a2], :]) ** 2, -1) + 1e-6)   # [B,N,K]
        return _rbf(d)                                                          # [B,N,K,16]

    edge_pairs = ['Ca-Ca', 'Ca-C', 'C-Ca', 'Ca-N', 'N-Ca', 'Ca-O', 'O-Ca', 'C-C',
                  'C-N', 'N-C', 'C-O', 'O-C', 'N-N', 'N-O', 'O-N', 'O-O']
    edge_dist = []
    for pr in edge_pairs:
        a1, a2 = pr.split('-')
        edge_dist.append(edge_rbf(a1, a2))
    for i in range(VIRTUAL_NUM):
        edge_dist.append(edge_rbf('v%d' % i, 'v%d' % i))
        for j in range(i):
            edge_dist.append(edge_rbf('v%d' % i, 'v%d' % j))
            edge_dist.append(edge_rbf('v%d' % j, 'v%d' % i))
    E_dist = jnp.concatenate(edge_dist, axis=-1)

    # bf16 storage of the wide feature matrices halves first-layer HBM traffic;
    # all BN stats / fold math downstream stays f32.
    node_feat = jnp.concatenate([V_dist, V_angles, V_direct], -1).astype(jnp.bfloat16)
    edge_feat = jnp.concatenate([E_dist, E_angles, E_direct], -1).astype(jnp.bfloat16)
    return node_feat, edge_feat, E_idx


# ----------------------------- Pallas hot path ------------------------------------
_COMPILER_PARAMS = pltpu.CompilerParams(
    dimension_semantics=("parallel",), vmem_limit_bytes=32 * 1024 * 1024)


def _linear_kernel(x_ref, w_ref, b_ref, o_ref, *, lrelu):
    # One row-tile: h = x @ W + b (MXU, f32 accumulate), optional LeakyReLU (VPU).
    h = jnp.dot(x_ref[...], w_ref[...], preferred_element_type=jnp.float32)
    h = h + b_ref[...]
    if lrelu:
        h = jnp.where(h > 0, h, LRELU_SLOPE * h)
    o_ref[...] = h.astype(o_ref.dtype)


def _linear_stats_kernel(x_ref, w_ref, b_ref, o_ref, stats_ref, *,
                         lrelu, n_valid, tile_rows):
    # Same as _linear_kernel, plus fused per-tile BatchNorm partial statistics
    # (sum, sum-of-squares) over the first n_valid rows only; padded rows carry
    # the bias value and must not leak into the batch statistics.
    h = jnp.dot(x_ref[...], w_ref[...], preferred_element_type=jnp.float32)
    h = h + b_ref[...]
    if lrelu:
        h = jnp.where(h > 0, h, LRELU_SLOPE * h)
    o_ref[...] = h.astype(o_ref.dtype)

    row0 = pl.program_id(0) * tile_rows
    rid = jax.lax.broadcasted_iota(jnp.int32, h.shape, 0) + row0
    hv = jnp.where(rid < n_valid, h, 0.0)
    s1 = jnp.sum(hv, axis=0, keepdims=True)        # [1, F]  sum of valid rows
    s2 = jnp.sum(hv * h, axis=0, keepdims=True)    # [1, F]  sum of valid h^2
    stats_ref[...] = jnp.concatenate([s1, s2], axis=0).reshape(1, 2, -1)


def _choose_tile(rows, cap=ROW_TILE_CAP):
    """Row tile so the last tile is nearly full (no ~2x padding waste) and there
    are >=2 tiles whenever rows >= 512 (megacore sharding on v7x)."""
    min_tiles = 2 if rows >= 512 else 1
    num_tiles = max(min_tiles, _cdiv(rows, cap))
    tile = _round_up(_cdiv(rows, num_tiles), 16)
    num_tiles = _cdiv(rows, tile)
    return tile, tile * num_tiles


def pallas_linear(x, w, b, *, lrelu, tile_rows, out_dtype, n_valid=None):
    """Row-tiled y = [LeakyReLU](x @ w + b).  x:[rows_pad, Fin], w:[Fin, Fout].

    If n_valid is given, additionally returns per-tile f32 (sum, sumsq) of the
    f32 activation over the first n_valid rows, for the downstream BN fold.
    Weights/bias are resident across the grid; row tiles stream through VMEM.
    """
    rows, fin = x.shape
    fout = w.shape[1]
    assert rows % tile_rows == 0
    num_tiles = rows // tile_rows

    x_spec = pl.BlockSpec((tile_rows, fin), lambda i: (i, 0))   # streamed row tiles
    w_spec = pl.BlockSpec((fin, fout), lambda i: (0, 0))        # resident weight
    b_spec = pl.BlockSpec((1, fout), lambda i: (0, 0))          # resident bias
    o_spec = pl.BlockSpec((tile_rows, fout), lambda i: (i, 0))

    if n_valid is None:
        out = pl.pallas_call(
            functools.partial(_linear_kernel, lrelu=lrelu),
            out_shape=jax.ShapeDtypeStruct((rows, fout), out_dtype),
            grid=(num_tiles,),
            in_specs=[x_spec, w_spec, b_spec],
            out_specs=o_spec,
            compiler_params=_COMPILER_PARAMS,
        )(x, w, b)
        return out, None

    s_spec = pl.BlockSpec((1, 2, fout), lambda i: (i, 0, 0))
    out, stats = pl.pallas_call(
        functools.partial(_linear_stats_kernel, lrelu=lrelu,
                          n_valid=n_valid, tile_rows=tile_rows),
        out_shape=(jax.ShapeDtypeStruct((rows, fout), out_dtype),
                   jax.ShapeDtypeStruct((num_tiles, 2, fout), jnp.float32)),
        grid=(num_tiles,),
        in_specs=[x_spec, w_spec, b_spec],
        out_specs=(o_spec, s_spec),
        compiler_params=_COMPILER_PARAMS,
    )(x, w, b)
    return out, stats


def _bn_fold_from_stats(stats, n_valid, gamma, beta, w_next, b_next):
    """Fold training-mode BatchNorm1d (batch stats, biased variance, eps=1e-5)
    into the following Linear using fused per-tile (sum, sumsq) statistics:
    BN(h) @ W + b == h @ W' + b'.  All math in f32.
    Note: padded gamma/beta/weight/bias lanes are exactly zero by construction
    (jnp.pad), so the pad columns contribute nothing to W'/b'."""
    s1 = jnp.sum(stats[:, 0, :], axis=0, keepdims=True)   # [1, F]
    s2 = jnp.sum(stats[:, 1, :], axis=0, keepdims=True)   # [1, F]
    inv_n = 1.0 / float(n_valid)
    mu = s1 * inv_n
    var = jnp.maximum(s2 * inv_n - mu * mu, 0.0)
    s = gamma * jax.lax.rsqrt(var + BN_EPS)                # [1, F]
    w_eff = w_next * s.reshape(-1, 1)
    b_eff = (beta - mu * s) @ w_next + b_next
    return w_eff, b_eff


def _pad2(a, r, c):
    return jnp.pad(a, ((0, r - a.shape[0]), (0, c - a.shape[1])))


def _pad_node_params(node_params):
    (w_ne, b_ne, g0, be0, w1, b1, g1, be1, w2, b2, g2, be2, w3, b3) = node_params
    P = FOLD_PAD
    return dict(
        # first-layer weight keeps its real 213-row extent (no column pad on x)
        w_ne=_pad2(w_ne, NODE_IN, P).astype(jnp.bfloat16), b_ne=_pad2(b_ne, 1, P),
        g0=_pad2(g0, 1, P), be0=_pad2(be0, 1, P),
        w1=_pad2(w1, P, P), b1=_pad2(b1, 1, P),
        g1=_pad2(g1, 1, P), be1=_pad2(be1, 1, P),
        w2=_pad2(w2, P, P), b2=_pad2(b2, 1, P),
        g2=_pad2(g2, 1, P), be2=_pad2(be2, 1, P),
        w3=_pad2(w3, P, P), b3=_pad2(b3, 1, P),
    )


def _pad_edge_params(edge_params):
    (w_ee, b_ee, ge, bee, w_E, b_E) = edge_params
    P = FOLD_PAD
    return dict(
        w_ee=_pad2(w_ee, EDGE_IN, P).astype(jnp.bfloat16), b_ee=_pad2(b_ee, 1, P),
        ge=_pad2(ge, 1, P), bee=_pad2(bee, 1, P),
        w_E=_pad2(w_E, P, P), b_E=_pad2(b_E, 1, P),
    )


def node_mlp(x_bf16, n_valid, tile, p):
    # node_embedding -> BN -> [Linear,LReLU,BN] x2 -> Linear.  BN batch stats are
    # produced inside the previous Pallas kernel and folded into the next Linear.
    h0, st0 = pallas_linear(x_bf16, p['w_ne'], p['b_ne'], lrelu=False, tile_rows=tile,
                            out_dtype=jnp.bfloat16, n_valid=n_valid)
    w1, b1 = _bn_fold_from_stats(st0, n_valid, p['g0'], p['be0'], p['w1'], p['b1'])
    h1, st1 = pallas_linear(h0, w1.astype(jnp.bfloat16), b1, lrelu=True, tile_rows=tile,
                            out_dtype=jnp.bfloat16, n_valid=n_valid)
    w2, b2 = _bn_fold_from_stats(st1, n_valid, p['g1'], p['be1'], p['w2'], p['b2'])
    h2, st2 = pallas_linear(h1, w2.astype(jnp.bfloat16), b2, lrelu=True, tile_rows=tile,
                            out_dtype=jnp.bfloat16, n_valid=n_valid)
    w3, b3 = _bn_fold_from_stats(st2, n_valid, p['g2'], p['be2'], p['w3'], p['b3'])
    h3, _ = pallas_linear(h2, w3.astype(jnp.bfloat16), b3, lrelu=False, tile_rows=tile,
                          out_dtype=jnp.float32)
    return h3[:n_valid, :FOLD_DIM]


def edge_mlp(x_bf16, n_valid, tile, p):
    # edge_embedding -> BN -> W_e
    h0, st0 = pallas_linear(x_bf16, p['w_ee'], p['b_ee'], lrelu=False, tile_rows=tile,
                            out_dtype=jnp.bfloat16, n_valid=n_valid)
    wE, bE = _bn_fold_from_stats(st0, n_valid, p['ge'], p['bee'], p['w_E'], p['b_E'])
    out, _ = pallas_linear(h0, wE.astype(jnp.bfloat16), bE, lrelu=False, tile_rows=tile,
                           out_dtype=jnp.float32)
    return out[:n_valid, :FOLD_DIM]


# ----------------------------- parameter init -------------------------------------
def init_params(key):
    ks = list(jax.random.split(key, 16))

    def xavier(k, fi, fo):
        lim = float(np.sqrt(6.0 / (fi + fo)))
        return jax.random.uniform(k, (fi, fo), jnp.float32, -lim, lim)

    def bias(k, fi, fo):
        lim = float(1.0 / np.sqrt(fi))
        return jax.random.uniform(k, (1, fo), jnp.float32, -lim, lim)

    ones = jnp.ones((1, FOLD_DIM), jnp.float32)
    zeros = jnp.zeros((1, FOLD_DIM), jnp.float32)

    virtual_atoms = jax.random.uniform(ks[0], (VIRTUAL_NUM, 3), jnp.float32)

    node_params = (
        xavier(ks[1], NODE_IN, FOLD_DIM), bias(ks[2], NODE_IN, FOLD_DIM),   # node_embedding
        ones, zeros,                                                        # norm_nodes (BN)
        xavier(ks[3], FOLD_DIM, FOLD_DIM), bias(ks[4], FOLD_DIM, FOLD_DIM), # W_v[0]
        ones, zeros,                                                        # W_v BN1
        xavier(ks[5], FOLD_DIM, FOLD_DIM), bias(ks[6], FOLD_DIM, FOLD_DIM), # W_v[3]
        ones, zeros,                                                        # W_v BN2
        xavier(ks[7], FOLD_DIM, FOLD_DIM), bias(ks[8], FOLD_DIM, FOLD_DIM), # W_v[6]
    )
    edge_params = (
        xavier(ks[9], EDGE_IN, FOLD_DIM), bias(ks[10], EDGE_IN, FOLD_DIM),  # edge_embedding
        ones, zeros,                                                        # norm_edges (BN)
        xavier(ks[11], FOLD_DIM, FOLD_DIM), bias(ks[12], FOLD_DIM, FOLD_DIM),  # W_e
    )
    return virtual_atoms, node_params, edge_params


# ----------------------------- full forward ---------------------------------------
@jax.jit
def _forward_impl(X, mask, node_sel, edge_sel, dst_sel, shift,
                  virtual_atoms, node_params, edge_params):
    B, L_max = X.shape[0], X.shape[1]
    K = min(TOP_K, L_max)

    node_feat, edge_feat, E_idx = compute_features(X, mask, virtual_atoms, TOP_K)

    # Compact valid rows (selection indices are static, derived from lengths only,
    # so E_idx never leaves the device).  Feature matrices are already bf16.
    # TODO(synk): fold this gather into the first pallas_linear via
    # PrefetchScalarGridSpec + pl.Element row-gather to save one more HBM pass.
    rec_na_in = jnp.take(node_feat.reshape(B * L_max, NODE_IN), node_sel, axis=0)
    rec_ea_in = jnp.take(edge_feat.reshape(B * L_max * K, EDGE_IN), edge_sel, axis=0)

    src = jnp.take((shift[:, None, None] + E_idx).reshape(-1), edge_sel, axis=0)
    rec_idx = jnp.stack([dst_sel, src], axis=0).astype(jnp.int32)

    n_nodes = rec_na_in.shape[0]
    n_edges = rec_ea_in.shape[0]

    # Row padding only (no column pad: first-layer blocks use the full 213/416
    # feature width), tiles chosen so the last tile is nearly full.
    tn, n_pad = _choose_tile(n_nodes)
    te, e_pad = _choose_tile(n_edges)
    node_x = jnp.pad(rec_na_in, ((0, n_pad - n_nodes), (0, 0)))
    edge_x = jnp.pad(rec_ea_in, ((0, e_pad - n_edges), (0, 0)))

    pN = _pad_node_params(node_params)
    pE = _pad_edge_params(edge_params)

    rec_na = node_mlp(node_x, n_nodes, tn, pN)
    rec_ea = edge_mlp(edge_x, n_edges, te, pE)
    return rec_na, rec_ea, rec_idx


def pifold_embedder_forward(X, lengths, virtual_atoms, node_params, edge_params):
    """X: [B, L_max, 4, 3] padded with zeros past each length (order N, Ca, C, O)."""
    B, L_max = X.shape[0], X.shape[1]
    K = min(TOP_K, L_max)
    # With top_k <= min(lengths), every neighbor of a valid node is valid, so
    # mask_attend[b,i,:] == mask[b,i] and the selection masks depend on lengths only.
    # TODO(synk): general ragged case (lengths < top_k) needs the full mask_attend select.
    assert min(lengths) >= K

    mask_np = np.zeros((B, L_max), dtype=np.float32)
    for i, l in enumerate(lengths):
        mask_np[i, :l] = 1.0
    node_sel = np.nonzero(mask_np.reshape(-1))[0].astype(np.int32)
    edge_sel = np.nonzero(np.repeat(mask_np.reshape(-1), K))[0].astype(np.int32)
    counts = mask_np.sum(1)
    shift = (np.cumsum(counts) - counts).astype(np.int32)
    dst_all = (shift[:, None, None]
               + np.broadcast_to(np.arange(L_max, dtype=np.int32)[None, :, None],
                                 (B, L_max, K))).reshape(-1)
    dst_sel = dst_all[edge_sel].astype(np.int32)

    return _forward_impl(X, jnp.asarray(mask_np), jnp.asarray(node_sel),
                         jnp.asarray(edge_sel), jnp.asarray(dst_sel),
                         jnp.asarray(shift), virtual_atoms,
                         tuple(node_params), tuple(edge_params))


# ----------------------------- main -----------------------------------------------
if __name__ == "__main__":
    key = jax.random.PRNGKey(0)
    k_pos, k_par = jax.random.split(key)

    lengths = [6, 8]                 # two proteins
    B, L_max = len(lengths), max(lengths)

    # backbone coords [B, L_max, 4, 3] in order (N, Ca, C, O); zero-pad past length
    X_np = np.array(jax.random.normal(k_pos, (B, L_max, 4, 3), jnp.float32)) * 3.0
    for i, l in enumerate(lengths):
        X_np[i, l:] = 0.0
    X = jnp.asarray(X_np)

    virtual_atoms, node_params, edge_params = init_params(k_par)

    rec_na, rec_ea, rec_idx = pifold_embedder_forward(X, lengths, virtual_atoms,
                                                      node_params, edge_params)
    jax.block_until_ready((rec_na, rec_ea, rec_idx))

    n_nodes = sum(lengths)
    n_edges = n_nodes * min(TOP_K, L_max)
    assert rec_na.shape == (n_nodes, FOLD_DIM)
    assert rec_ea.shape == (n_edges, FOLD_DIM)
    assert rec_idx.shape == (2, n_edges)
    assert np.isfinite(np.asarray(rec_na)).all() and np.isfinite(np.asarray(rec_ea)).all()
    print("KERNEL_OK")
</pallas_src>

<mosaic_0001>
module attributes {stable_mosaic.version = 11 : i64} {
  func.func @_linear_kernel(%arg0: i32, %arg1: memref<16x128xbf16, #tpu.memory_space<vmem>>, %arg2: memref<128x128xbf16, #tpu.memory_space<vmem>>, %arg3: memref<1x128xf32, #tpu.memory_space<vmem>>, %arg4: memref<16x128xf32, #tpu.memory_space<vmem>>) attributes {dimension_semantics = [#tpu.dimension_semantics<parallel>], iteration_bounds = array<i64: 1>, scalar_prefetch = 0 : i64, scratch_operands = 0 : i64, tpu.core_type = #tpu.core_type<tc>, window_params = [{transform_indices = @transform_0, window_bounds = array<i64: 16, 128>}, {pipeline_mode = #tpu.pipeline_mode<synchronous>, transform_indices = @transform_1, window_bounds = array<i64: 128, 128>}, {pipeline_mode = #tpu.pipeline_mode<synchronous>, transform_indices = @transform_2, window_bounds = array<i64: 1, 128>}, {transform_indices = @transform_3, window_bounds = array<i64: 16, 128>}]} {
    %c0 = arith.constant 0 : index
    %c0_0 = arith.constant 0 : index
    %0 = vector.load %arg1[%c0, %c0_0] : memref<16x128xbf16, #tpu.memory_space<vmem>>, vector<16x128xbf16>
    %c0_1 = arith.constant 0 : index
    %c0_2 = arith.constant 0 : index
    %1 = vector.load %arg2[%c0_1, %c0_2] : memref<128x128xbf16, #tpu.memory_space<vmem>>, vector<128x128xbf16>
    %cst = arith.constant dense<0.000000e+00> : vector<16x128xf32>
    %2 = tpu.matmul %0, %1, %cst {dimension_numbers = #tpu.dot_dimension_numbers<[1], [0], [0], [1], [0, 0, 1, 1], [], []>} : vector<16x128xbf16>, vector<128x128xbf16>, vector<16x128xf32> -> vector<16x128xf32>
    %c0_3 = arith.constant 0 : index
    %c0_4 = arith.constant 0 : index
    %3 = vector.load %arg3[%c0_3, %c0_4] : memref<1x128xf32, #tpu.memory_space<vmem>>, vector<1x128xf32>
    %4 = vector.broadcast %3 : vector<1x128xf32> to vector<16x128xf32>
    %5 = arith.addf %2, %4 : vector<16x128xf32>
    %c0_5 = arith.constant 0 : index
    %c0_6 = arith.constant 0 : index
    %6 = vector.load %arg4[%c0_5, %c0_6] : memref<16x128xf32, #tpu.memory_space<vmem>>, vector<16x128xf32>
    tpu.vector_store %arg4[%c0_5, %c0_6], %5 {strides = array<i32>} : memref<16x128xf32, #tpu.memory_space<vmem>>, vector<16x128xf32>,
    return
  }
  func.func @transform_0(%arg0: i32) -> (i32, i32) {
    %c0_i32 = arith.constant 0 : i32
    %c0_i32_0 = arith.constant 0 : i32
    return %arg0, %c0_i32 : i32, i32
  }
  func.func @transform_1(%arg0: i32) -> (i32, i32) {
    %c0_i32 = arith.constant 0 : i32
    %c0_i32_0 = arith.constant 0 : i32
    %c0_i32_1 = arith.constant 0 : i32
    return %c0_i32, %c0_i32_0 : i32, i32
  }
  func.func @transform_2(%arg0: i32) -> (i32, i32) {
    %c0_i32 = arith.constant 0 : i32
    %c0_i32_0 = arith.constant 0 : i32
    %c0_i32_1 = arith.constant 0 : i32
    return %c0_i32, %c0_i32_0 : i32, i32
  }
  func.func @transform_3(%arg0: i32) -> (i32, i32) {
    %c0_i32 = arith.constant 0 : i32
    %c0_i32_0 = arith.constant 0 : i32
    return %arg0, %c0_i32 : i32, i32
  }
}

module attributes {stable_mosaic.version = 11 : i64} {
  func.func @_linear_stats_kernel(%arg0: i32, %arg1: memref<16x213xbf16, #tpu.memory_space<vmem>>, %arg2: memref<213x128xbf16, #tpu.memory_space<vmem>>, %arg3: memref<1x128xf32, #tpu.memory_space<vmem>>, %arg4: memref<16x128xbf16, #tpu.memory_space<vmem>>, %arg5: memref<1x2x128xf32, #tpu.memory_space<vmem>>) attributes {dimension_semantics = [#tpu.dimension_semantics<parallel>], iteration_bounds = array<i64: 1>, scalar_prefetch = 0 : i64, scratch_operands = 0 : i64, tpu.core_type = #tpu.core_type<tc>, window_params = [{transform_indices = @transform_0, window_bounds = array<i64: 16, 213>}, {pipeline_mode = #tpu.pipeline_mode<synchronous>, transform_indices = @transform_1, window_bounds = array<i64: 213, 128>}, {pipeline_mode = #tpu.pipeline_mode<synchronous>, transform_indices = @transform_2, window_bounds = array<i64: 1, 128>}, {transform_indices = @transform_3, window_bounds = array<i64: 16, 128>}, {transform_indices = @transform_4, window_bounds = array<i64: 1, 2, 128>}]} {
    %c0 = arith.constant 0 : index
    %c0_0 = arith.constant 0 : index
    %0 = vector.load %arg1[%c0, %c0_0] : memref<16x213xbf16, #tpu.memory_space<vmem>>, vector<16x213xbf16>
    %c0_1 = arith.constant 0 : index
    %c0_2 = arith.constant 0 : index
    %1 = vector.load %arg2[%c0_1, %c0_2] : memref<213x128xbf16, #tpu.memory_space<vmem>>, vector<213x128xbf16>
    %cst = arith.constant dense<0.000000e+00> : vector<16x128xf32>
    %2 = tpu.matmul %0, %1, %cst {dimension_numbers = #tpu.dot_dimension_numbers<[1], [0], [0], [1], [0, 0, 1, 1], [], []>} : vector<16x213xbf16>, vector<213x128xbf16>, vector<16x128xf32> -> vector<16x128xf32>
    %c0_3 = arith.constant 0 : index
    %c0_4 = arith.constant 0 : index
    %3 = vector.load %arg3[%c0_3, %c0_4] : memref<1x128xf32, #tpu.memory_space<vmem>>, vector<1x128xf32>
    %4 = vector.broadcast %3 : vector<1x128xf32> to vector<16x128xf32>
    %5 = arith.addf %2, %4 : vector<16x128xf32>
    %6 = arith.truncf %5 : vector<16x128xf32> to vector<16x128xbf16>
    %c0_5 = arith.constant 0 : index
    %c0_6 = arith.constant 0 : index
    %7 = vector.load %arg4[%c0_5, %c0_6] : memref<16x128xbf16, #tpu.memory_space<vmem>>, vector<16x128xbf16>
    tpu.vector_store %arg4[%c0_5, %c0_6], %6 {strides = array<i32>} : memref<16x128xbf16, #tpu.memory_space<vmem>>, vector<16x128xbf16>,
    %c16_i32 = arith.constant 16 : i32
    %8 = arith.muli %arg0, %c16_i32 : i32
    %9 = tpu.iota {dimensions = array<i32: 0>} : vector<16x128xi32>
    %10 = vector.broadcast %8 : i32 to vector<16x128xi32>
    %11 = arith.addi %9, %10 : vector<16x128xi32>
    %c14_i32 = arith.constant 14 : i32
    %12 = vector.broadcast %c14_i32 : i32 to vector<16x128xi32>
    %13 = arith.cmpi slt, %11, %12 : vector<16x128xi32>
    %cst_7 = arith.constant 0.000000e+00 : f32
    %14 = vector.broadcast %cst_7 : f32 to vector<16x128xf32>
    %15 = arith.select %13, %5, %14 : vector<16x128xi1>, vector<16x128xf32>
    %cst_8 = arith.constant dense<0.000000e+00> : vector<128xf32>
    %16 = vector.multi_reduction <add>, %15, %cst_8 [0] : vector<16x128xf32> to vector<128xf32>
    %17 = vector.shape_cast %16 : vector<128xf32> to vector<1x128xf32>
    %18 = arith.mulf %15, %5 : vector<16x128xf32>
    %cst_9 = arith.constant dense<0.000000e+00> : vector<128xf32>
    %19 = vector.multi_reduction <add>, %18, %cst_9 [0] : vector<16x128xf32> to vector<128xf32>
    %20 = vector.shape_cast %19 : vector<128xf32> to vector<1x128xf32>
    %21 = tpu.concatenate %17, %20 in 0 : vector<1x128xf32>, vector<1x128xf32> -> vector<2x128xf32>
    %22 = vector.shape_cast %21 : vector<2x128xf32> to vector<1x2x128xf32>
    %c0_10 = arith.constant 0 : index
    %c0_11 = arith.constant 0 : index
    %c0_12 = arith.constant 0 : index
    %23 = vector.load %arg5[%c0_10, %c0_11, %c0_12] : memref<1x2x128xf32, #tpu.memory_space<vmem>>, vector<1x2x128xf32>
    tpu.vector_store %arg5[%c0_10, %c0_11, %c0_12], %22 {strides = array<i32>} : memref<1x2x128xf32, #tpu.memory_space<vmem>>, vector<1x2x128xf32>,
    return
  }
  func.func @transform_0(%arg0: i32) -> (i32, i32) {
    %c0_i32 = arith.constant 0 : i32
    %c0_i32_0 = arith.constant 0 : i32
    return %arg0, %c0_i32 : i32, i32
  }
  func.func @transform_1(%arg0: i32) -> (i32, i32) {
    %c0_i32 = arith.constant 0 : i32
    %c0_i32_0 = arith.constant 0 : i32
    %c0_i32_1 = arith.constant 0 : i32
    return %c0_i32, %c0_i32_0 : i32, i32
  }
  func.func @transform_2(%arg0: i32) -> (i32, i32) {
    %c0_i32 = arith.constant 0 : i32
    %c0_i32_0 = arith.constant 0 : i32
    %c0_i32_1 = arith.constant 0 : i32
    return %c0_i32, %c0_i32_0 : i32, i32
  }
  func.func @transform_3(%arg0: i32) -> (i32, i32) {
    %c0_i32 = arith.constant 0 : i32
    %c0_i32_0 = arith.constant 0 : i32
    return %arg0, %c0_i32 : i32, i32
  }
  func.func @transform_4(%arg0: i32) -> (i32, i32, i32) {
    %c0_i32 = arith.constant 0 : i32
    %c0_i32_0 = arith.constant 0 : i32
    %c0_i32_1 = arith.constant 0 : i32
    return %arg0, %c0_i32, %c0_i32_0 : i32, i32, i32
  }
}

module attributes {stable_mosaic.version = 11 : i64} {
  func.func @_linear_stats_kernel(%arg0: i32, %arg1: memref<16x128xbf16, #tpu.memory_space<vmem>>, %arg2: memref<128x128xbf16, #tpu.memory_space<vmem>>, %arg3: memref<1x128xf32, #tpu.memory_space<vmem>>, %arg4: memref<16x128xbf16, #tpu.memory_space<vmem>>, %arg5: memref<1x2x128xf32, #tpu.memory_space<vmem>>) attributes {dimension_semantics = [#tpu.dimension_semantics<parallel>], iteration_bounds = array<i64: 1>, scalar_prefetch = 0 : i64, scratch_operands = 0 : i64, tpu.core_type = #tpu.core_type<tc>, window_params = [{transform_indices = @transform_0, window_bounds = array<i64: 16, 128>}, {pipeline_mode = #tpu.pipeline_mode<synchronous>, transform_indices = @transform_1, window_bounds = array<i64: 128, 128>}, {pipeline_mode = #tpu.pipeline_mode<synchronous>, transform_indices = @transform_2, window_bounds = array<i64: 1, 128>}, {transform_indices = @transform_3, window_bounds = array<i64: 16, 128>}, {transform_indices = @transform_4, window_bounds = array<i64: 1, 2, 128>}]} {
    %c0 = arith.constant 0 : index
    %c0_0 = arith.constant 0 : index
    %0 = vector.load %arg1[%c0, %c0_0] : memref<16x128xbf16, #tpu.memory_space<vmem>>, vector<16x128xbf16>
    %c0_1 = arith.constant 0 : index
    %c0_2 = arith.constant 0 : index
    %1 = vector.load %arg2[%c0_1, %c0_2] : memref<128x128xbf16, #tpu.memory_space<vmem>>, vector<128x128xbf16>
    %cst = arith.constant dense<0.000000e+00> : vector<16x128xf32>
    %2 = tpu.matmul %0, %1, %cst {dimension_numbers = #tpu.dot_dimension_numbers<[1], [0], [0], [1], [0, 0, 1, 1], [], []>} : vector<16x128xbf16>, vector<128x128xbf16>, vector<16x128xf32> -> vector<16x128xf32>
    %c0_3 = arith.constant 0 : index
    %c0_4 = arith.constant 0 : index
    %3 = vector.load %arg3[%c0_3, %c0_4] : memref<1x128xf32, #tpu.memory_space<vmem>>, vector<1x128xf32>
    %4 = vector.broadcast %3 : vector<1x128xf32> to vector<16x128xf32>
    %5 = arith.addf %2, %4 : vector<16x128xf32>
    %cst_5 = arith.constant 0.000000e+00 : f32
    %6 = vector.broadcast %cst_5 : f32 to vector<16x128xf32>
    %7 = arith.cmpf ogt, %5, %6 : vector<16x128xf32>
    %cst_6 = arith.constant 0.00999999977 : f32
    %8 = vector.broadcast %cst_6 : f32 to vector<16x128xf32>
    %9 = arith.mulf %8, %5 : vector<16x128xf32>
    %10 = arith.select %7, %5, %9 : vector<16x128xi1>, vector<16x128xf32>
    %11 = arith.truncf %10 : vector<16x128xf32> to vector<16x128xbf16>
    %c0_7 = arith.constant 0 : index
    %c0_8 = arith.constant 0 : index
    %12 = vector.load %arg4[%c0_7, %c0_8] : memref<16x128xbf16, #tpu.memory_space<vmem>>, vector<16x128xbf16>
    tpu.vector_store %arg4[%c0_7, %c0_8], %11 {strides = array<i32>} : memref<16x128xbf16, #tpu.memory_space<vmem>>, vector<16x128xbf16>,
    %c16_i32 = arith.constant 16 : i32
    %13 = arith.muli %arg0, %c16_i32 : i32
    %14 = tpu.iota {dimensions = array<i32: 0>} : vector<16x128xi32>
    %15 = vector.broadcast %13 : i32 to vector<16x128xi32>
    %16 = arith.addi %14, %15 : vector<16x128xi32>
    %c14_i32 = arith.constant 14 : i32
    %17 = vector.broadcast %c14_i32 : i32 to vector<16x128xi32>
    %18 = arith.cmpi slt, %16, %17 : vector<16x128xi32>
    %cst_9 = arith.constant 0.000000e+00 : f32
    %19 = vector.broadcast %cst_9 : f32 to vector<16x128xf32>
    %20 = arith.select %18, %10, %19 : vector<16x128xi1>, vector<16x128xf32>
    %cst_10 = arith.constant dense<0.000000e+00> : vector<128xf32>
    %21 = vector.multi_reduction <add>, %20, %cst_10 [0] : vector<16x128xf32> to vector<128xf32>
    %22 = vector.shape_cast %21 : vector<128xf32> to vector<1x128xf32>
    %23 = arith.mulf %20, %10 : vector<16x128xf32>
    %cst_11 = arith.constant dense<0.000000e+00> : vector<128xf32>
    %24 = vector.multi_reduction <add>, %23, %cst_11 [0] : vector<16x128xf32> to vector<128xf32>
    %25 = vector.shape_cast %24 : vector<128xf32> to vector<1x128xf32>
    %26 = tpu.concatenate %22, %25 in 0 : vector<1x128xf32>, vector<1x128xf32> -> vector<2x128xf32>
    %27 = vector.shape_cast %26 : vector<2x128xf32> to vector<1x2x128xf32>
    %c0_12 = arith.constant 0 : index
    %c0_13 = arith.constant 0 : index
    %c0_14 = arith.constant 0 : index
    %28 = vector.load %arg5[%c0_12, %c0_13, %c0_14] : memref<1x2x128xf32, #tpu.memory_space<vmem>>, vector<1x2x128xf32>
    tpu.vector_store %arg5[%c0_12, %c0_13, %c0_14], %27 {strides = array<i32>} : memref<1x2x128xf32, #tpu.memory_space<vmem>>, vector<1x2x128xf32>,
    return
  }
  func.func @transform_0(%arg0: i32) -> (i32, i32) {
    %c0_i32 = arith.constant 0 : i32
    %c0_i32_0 = arith.constant 0 : i32
    return %arg0, %c0_i32 : i32, i32
  }
  func.func @transform_1(%arg0: i32) -> (i32, i32) {
    %c0_i32 = arith.constant 0 : i32
    %c0_i32_0 = arith.constant 0 : i32
    %c0_i32_1 = arith.constant 0 : i32
    return %c0_i32, %c0_i32_0 : i32, i32
  }
  func.func @transform_2(%arg0: i32) -> (i32, i32) {
    %c0_i32 = arith.constant 0 : i32
    %c0_i32_0 = arith.constant 0 : i32
    %c0_i32_1 = arith.constant 0 : i32
    return %c0_i32, %c0_i32_0 : i32, i32
  }
  func.func @transform_3(%arg0: i32) -> (i32, i32) {
    %c0_i32 = arith.constant 0 : i32
    %c0_i32_0 = arith.constant 0 : i32
    return %arg0, %c0_i32 : i32, i32
  }
  func.func @transform_4(%arg0: i32) -> (i32, i32, i32) {
    %c0_i32 = arith.constant 0 : i32
    %c0_i32_0 = arith.constant 0 : i32
    %c0_i32_1 = arith.constant 0 : i32
    return %arg0, %c0_i32, %c0_i32_0 : i32, i32, i32
  }
}

module attributes {stable_mosaic.version = 11 : i64} {
  func.func @_linear_stats_kernel(%arg0: i32, %arg1: memref<80x416xbf16, #tpu.memory_space<vmem>>, %arg2: memref<416x128xbf16, #tpu.memory_space<vmem>>, %arg3: memref<1x128xf32, #tpu.memory_space<vmem>>, %arg4: memref<80x128xbf16, #tpu.memory_space<vmem>>, %arg5: memref<1x2x128xf32, #tpu.memory_space<vmem>>) attributes {dimension_semantics = [#tpu.dimension_semantics<parallel>], iteration_bounds = array<i64: 1>, scalar_prefetch = 0 : i64, scratch_operands = 0 : i64, tpu.core_type = #tpu.core_type<tc>, window_params = [{transform_indices = @transform_0, window_bounds = array<i64: 80, 416>}, {pipeline_mode = #tpu.pipeline_mode<synchronous>, transform_indices = @transform_1, window_bounds = array<i64: 416, 128>}, {pipeline_mode = #tpu.pipeline_mode<synchronous>, transform_indices = @transform_2, window_bounds = array<i64: 1, 128>}, {transform_indices = @transform_3, window_bounds = array<i64: 80, 128>}, {transform_indices = @transform_4, window_bounds = array<i64: 1, 2, 128>}]} {
    %c0 = arith.constant 0 : index
    %c0_0 = arith.constant 0 : index
    %0 = vector.load %arg1[%c0, %c0_0] : memref<80x416xbf16, #tpu.memory_space<vmem>>, vector<80x416xbf16>
    %c0_1 = arith.constant 0 : index
    %c0_2 = arith.constant 0 : index
    %1 = vector.load %arg2[%c0_1, %c0_2] : memref<416x128xbf16, #tpu.memory_space<vmem>>, vector<416x128xbf16>
    %cst = arith.constant dense<0.000000e+00> : vector<80x128xf32>
    %2 = tpu.matmul %0, %1, %cst {dimension_numbers = #tpu.dot_dimension_numbers<[1], [0], [0], [1], [0, 0, 1, 1], [], []>} : vector<80x416xbf16>, vector<416x128xbf16>, vector<80x128xf32> -> vector<80x128xf32>
    %c0_3 = arith.constant 0 : index
    %c0_4 = arith.constant 0 : index
    %3 = vector.load %arg3[%c0_3, %c0_4] : memref<1x128xf32, #tpu.memory_space<vmem>>, vector<1x128xf32>
    %4 = vector.broadcast %3 : vector<1x128xf32> to vector<80x128xf32>
    %5 = arith.addf %2, %4 : vector<80x128xf32>
    %6 = arith.truncf %5 : vector<80x128xf32> to vector<80x128xbf16>
    %c0_5 = arith.constant 0 : index
    %c0_6 = arith.constant 0 : index
    %7 = vector.load %arg4[%c0_5, %c0_6] : memref<80x128xbf16, #tpu.memory_space<vmem>>, vector<80x128xbf16>
    tpu.vector_store %arg4[%c0_5, %c0_6], %6 {strides = array<i32>} : memref<80x128xbf16, #tpu.memory_space<vmem>>, vector<80x128xbf16>,
    %c80_i32 = arith.constant 80 : i32
    %8 = arith.muli %arg0, %c80_i32 : i32
    %9 = tpu.iota {dimensions = array<i32: 0>} : vector<80x128xi32>
    %10 = vector.broadcast %8 : i32 to vector<80x128xi32>
    %11 = arith.addi %9, %10 : vector<80x128xi32>
    %c70_i32 = arith.constant 70 : i32
    %12 = vector.broadcast %c70_i32 : i32 to vector<80x128xi32>
    %13 = arith.cmpi slt, %11, %12 : vector<80x128xi32>
    %cst_7 = arith.constant 0.000000e+00 : f32
    %14 = vector.broadcast %cst_7 : f32 to vector<80x128xf32>
    %15 = arith.select %13, %5, %14 : vector<80x128xi1>, vector<80x128xf32>
    %cst_8 = arith.constant dense<0.000000e+00> : vector<128xf32>
    %16 = vector.multi_reduction <add>, %15, %cst_8 [0] : vector<80x128xf32> to vector<128xf32>
    %17 = vector.shape_cast %16 : vector<128xf32> to vector<1x128xf32>
    %18 = arith.mulf %15, %5 : vector<80x128xf32>
    %cst_9 = arith.constant dense<0.000000e+00> : vector<128xf32>
    %19 = vector.multi_reduction <add>, %18, %cst_9 [0] : vector<80x128xf32> to vector<128xf32>
    %20 = vector.shape_cast %19 : vector<128xf32> to vector<1x128xf32>
    %21 = tpu.concatenate %17, %20 in 0 : vector<1x128xf32>, vector<1x128xf32> -> vector<2x128xf32>
    %22 = vector.shape_cast %21 : vector<2x128xf32> to vector<1x2x128xf32>
    %c0_10 = arith.constant 0 : index
    %c0_11 = arith.constant 0 : index
    %c0_12 = arith.constant 0 : index
    %23 = vector.load %arg5[%c0_10, %c0_11, %c0_12] : memref<1x2x128xf32, #tpu.memory_space<vmem>>, vector<1x2x128xf32>
    tpu.vector_store %arg5[%c0_10, %c0_11, %c0_12], %22 {strides = array<i32>} : memref<1x2x128xf32, #tpu.memory_space<vmem>>, vector<1x2x128xf32>,
    return
  }
  func.func @transform_0(%arg0: i32) -> (i32, i32) {
    %c0_i32 = arith.constant 0 : i32
    %c0_i32_0 = arith.constant 0 : i32
    return %arg0, %c0_i32 : i32, i32
  }
  func.func @transform_1(%arg0: i32) -> (i32, i32) {
    %c0_i32 = arith.constant 0 : i32
    %c0_i32_0 = arith.constant 0 : i32
    %c0_i32_1 = arith.constant 0 : i32
    return %c0_i32, %c0_i32_0 : i32, i32
  }
  func.func @transform_2(%arg0: i32) -> (i32, i32) {
    %c0_i32 = arith.constant 0 : i32
    %c0_i32_0 = arith.constant 0 : i32
    %c0_i32_1 = arith.constant 0 : i32
    return %c0_i32, %c0_i32_0 : i32, i32
  }
  func.func @transform_3(%arg0: i32) -> (i32, i32) {
    %c0_i32 = arith.constant 0 : i32
    %c0_i32_0 = arith.constant 0 : i32
    return %arg0, %c0_i32 : i32, i32
  }
  func.func @transform_4(%arg0: i32) -> (i32, i32, i32) {
    %c0_i32 = arith.constant 0 : i32
    %c0_i32_0 = arith.constant 0 : i32
    %c0_i32_1 = arith.constant 0 : i32
    return %arg0, %c0_i32, %c0_i32_0 : i32, i32, i32
  }
}

module attributes {stable_mosaic.version = 11 : i64} {
  func.func @_linear_kernel(%arg0: i32, %arg1: memref<80x128xbf16, #tpu.memory_space<vmem>>, %arg2: memref<128x128xbf16, #tpu.memory_space<vmem>>, %arg3: memref<1x128xf32, #tpu.memory_space<vmem>>, %arg4: memref<80x128xf32, #tpu.memory_space<vmem>>) attributes {dimension_semantics = [#tpu.dimension_semantics<parallel>], iteration_bounds = array<i64: 1>, scalar_prefetch = 0 : i64, scratch_operands = 0 : i64, tpu.core_type = #tpu.core_type<tc>, window_params = [{transform_indices = @transform_0, window_bounds = array<i64: 80, 128>}, {pipeline_mode = #tpu.pipeline_mode<synchronous>, transform_indices = @transform_1, window_bounds = array<i64: 128, 128>}, {pipeline_mode = #tpu.pipeline_mode<synchronous>, transform_indices = @transform_2, window_bounds = array<i64: 1, 128>}, {transform_indices = @transform_3, window_bounds = array<i64: 80, 128>}]} {
    %c0 = arith.constant 0 : index
    %c0_0 = arith.constant 0 : index
    %0 = vector.load %arg1[%c0, %c0_0] : memref<80x128xbf16, #tpu.memory_space<vmem>>, vector<80x128xbf16>
    %c0_1 = arith.constant 0 : index
    %c0_2 = arith.constant 0 : index
    %1 = vector.load %arg2[%c0_1, %c0_2] : memref<128x128xbf16, #tpu.memory_space<vmem>>, vector<128x128xbf16>
    %cst = arith.constant dense<0.000000e+00> : vector<80x128xf32>
    %2 = tpu.matmul %0, %1, %cst {dimension_numbers = #tpu.dot_dimension_numbers<[1], [0], [0], [1], [0, 0, 1, 1], [], []>} : vector<80x128xbf16>, vector<128x128xbf16>, vector<80x128xf32> -> vector<80x128xf32>
    %c0_3 = arith.constant 0 : index
    %c0_4 = arith.constant 0 : index
    %3 = vector.load %arg3[%c0_3, %c0_4] : memref<1x128xf32, #tpu.memory_space<vmem>>, vector<1x128xf32>
    %4 = vector.broadcast %3 : vector<1x128xf32> to vector<80x128xf32>
    %5 = arith.addf %2, %4 : vector<80x128xf32>
    %c0_5 = arith.constant 0 : index
    %c0_6 = arith.constant 0 : index
    %6 = vector.load %arg4[%c0_5, %c0_6] : memref<80x128xf32, #tpu.memory_space<vmem>>, vector<80x128xf32>
    tpu.vector_store %arg4[%c0_5, %c0_6], %5 {strides = array<i32>} : memref<80x128xf32, #tpu.memory_space<vmem>>, vector<80x128xf32>,
    return
  }
  func.func @transform_0(%arg0: i32) -> (i32, i32) {
    %c0_i32 = arith.constant 0 : i32
    %c0_i32_0 = arith.constant 0 : i32
    return %arg0, %c0_i32 : i32, i32
  }
  func.func @transform_1(%arg0: i32) -> (i32, i32) {
    %c0_i32 = arith.constant 0 : i32
    %c0_i32_0 = arith.constant 0 : i32
    %c0_i32_1 = arith.constant 0 : i32
    return %c0_i32, %c0_i32_0 : i32, i32
  }
  func.func @transform_2(%arg0: i32) -> (i32, i32) {
    %c0_i32 = arith.constant 0 : i32
    %c0_i32_0 = arith.constant 0 : i32
    %c0_i32_1 = arith.constant 0 : i32
    return %c0_i32, %c0_i32_0 : i32, i32
  }
  func.func @transform_3(%arg0: i32) -> (i32, i32) {
    %c0_i32 = arith.constant 0 : i32
    %c0_i32_0 = arith.constant 0 : i32
    return %arg0, %c0_i32 : i32, i32
  }
}

</mosaic_0001>

<bundles_post_ra>
// kernel: _forward_impl.9
= control target key start
LH: loop header
LB: loop body
LE: loop exit
PB: predicated region body
PF: predicated region fallthrough
CT: control target
= control target key end

     0   :  { %s256_s0 = inlined_call_operand.vmem [shape: bf16[16,128], index: 0, kind: input, shape index: {}]   ;;  %s257_s1 = inlined_call_operand.vmem [shape: bf16[128,128], index: 1, kind: input, shape index: {}]   ;;  %s258_s2 = inlined_call_operand.vmem [shape: f32[1,128], index: 2, kind: input, shape index: {}]   ;;  %s259_s3 = inlined_call_operand.hbm [shape: f32[16,128], index: 3, kind: output, shape index: {}]  }
   0x1   :  { %v169_v0 = vld [vmem:[%s257_s1 + $0x38] sm:$0xff]  ;;  %v168_v1 = vld [vmem:[%s257_s1 + $0x30] sm:$0xff] }
   0x2   :  { %91 = vmatpush.bf16.msra.mxu0 %v169_v0 }
   0x3   :  { %8 = vsyncpa [#allocation3], 0  ;;  %v167_v2 = vld [vmem:[%s257_s1 + $0x28] sm:$0xff]  ;;  %v166_v3 = vld [vmem:[%s257_s1 + $0x20] sm:$0xff]  ;;  %s200_s5 = smov [#allocation2]   ;;  %s113_s9 = sshll.u32 %s259_s3, 4  ;;  %s114_s9 = int_to_ptr.hbm [resolvable:$true] %s113_s9 }
   0x4   :  { %v165_v4 = vld [vmem:[%s257_s1 + $0x18] sm:$0xff]  ;;  %v164_v5 = vld [vmem:[%s257_s1 + $0x10] sm:$0xff]  ;;  %v163_v6 = vld [vmem:[%s257_s1 + $0x8] sm:$0xff]  ;;  %s111_s6 = sshll.u32 %s200_s5, 4  ;;  %s112_s6 = int_to_ptr.vmem [resolvable:$true] %s111_s6 }
   0x5   :  { %v162_v7 = vld [vmem:[%s257_s1] sm:$0xff]  ;;  %s202_s1 = smov 8  }
   0x6   :  { %92 = vmatpush.bf16.msra.mxu0 %v168_v1  ;;  %v161_v8 = vld [vmem:[%s256_s0] sm:$0xff]  ;;  %s201_s0 = smov 128  }
   0x7   :  { %v173_v9 = vld [vmem:[%s258_s2] ss:$0 sm:$0xff] }
   0xa   :  { %93 = vmatpush.bf16.msra.mxu0 %v167_v2 }
   0xe   :  { %94 = vmatpush.bf16.msra.mxu0 %v166_v3 }
  0x12   :  { %95 = vmatpush.bf16.msra.mxu0 %v165_v4 }
  0x16   :  { %96 = vmatpush.bf16.msra.mxu0 %v164_v5 }
  0x1a   :  { %97 = vmatpush.bf16.msra.mxu0 %v163_v6 }
  0x1e   :  { %98 = vmatpush.bf16.msra.mxu0 %v162_v7 }
  0x21   :  { %99 = vmatmul.bf16.vlgmr.msra.gmra.mxu0 %v161_v8 }
  0x9e   :  { %v100_v10 = vpop.f32.mrf.mxu0 }
  0x9f   :  { %v101_v11 = vadd.f32 %v173_v9, %v100_v10 }
  0xa1   :  { %105 = vst [vmem:[#allocation2] sm:$0xff] %v101_v11 }
  0xa6   :  { %v102_v12 = vpop.f32.mrf.mxu0 }
  0xa7   :  { %v103_v13 = vadd.f32 %v173_v9, %v102_v12 }
  0xa9   :  { %106 = vst [vmem:[#allocation2 + $0x8] sm:$0xff] %v103_v13 }
  0xaa   :  { %119 = dma.vmem_to_hbm [thread:$0]  %s112_s6, 256, %s114_s9, [#allocation3], %s201_s0, %s201_s0, %s202_s1  }
  0xab   :  { %198 = dma.done.wait [#allocation3], 256  }
  0xac   :  { %199 = vsyncadd [#allocation3], 4294967040 }
  0xad   :  { %124 = vsyncpa [#allocation3], 1 }

// kernel: _forward_impl.7
= control target key start
LH: loop header
LB: loop body
LE: loop exit
PB: predicated region body
PF: predicated region fallthrough
CT: control target
= control target key end

     0   :  { %v117_v9 = vlaneseq  ;;  %vm143_vm3 = vcmask 1040384   ;;  %s266_s1 = inlined_call_operand.vmem [shape: bf16[128,128], index: 1, kind: input, shape index: {}]   ;;  %s267_s2 = inlined_call_operand.vmem [shape: f32[1,128], index: 2, kind: input, shape index: {}]   ;;  %s268_s0 = inlined_call_operand.vmem [shape: bf16[16,128], index: 0, kind: input, shape index: {}]   ;;  %s269_s3 = inlined_call_operand.vmem [shape: bf16[16,128], index: 3, kind: output, shape index: {0}]   ;;  %s270_s4 = inlined_call_operand.vmem [shape: f32[1,2,128], index: 4, kind: output, shape index: {1}]  }
   0x1   :  { %v198_v0 = vld [vmem:[%s266_s1 + $0x38] sm:$0xff]  ;;  %v197_v1 = vld [vmem:[%s266_s1 + $0x30] sm:$0xff]  ;;  %v196_v2 = vld [vmem:[%s266_s1 + $0x28] sm:$0xff] }
   0x2   :  { %92 = vmatpush.bf16.msra.mxu0 %v198_v0  ;;  %v195_v3 = vld [vmem:[%s266_s1 + $0x20] sm:$0xff]  ;;  %v194_v4 = vld [vmem:[%s266_s1 + $0x18] sm:$0xff]  ;;  %v193_v5 = vld [vmem:[%s266_s1 + $0x10] sm:$0xff]  ;;  %v118_v12 = vshrl.u32 %v117_v9, 7 }
   0x3   :  { %v192_v6 = vld [vmem:[%s266_s1 + $0x8] sm:$0xff]  ;;  %v191_v7 = vld [vmem:[%s266_s1] sm:$0xff] }
   0x4   :  { %v190_v8 = vld [vmem:[%s268_s0] sm:$0xff]  ;;  %v119_v14 = vadd.s32 8, %v118_v12 }
   0x5   :  { %v204_v10 = vld [vmem:[%s267_s2] ss:$0 sm:$0xff] }
   0x6   :  { %93 = vmatpush.bf16.msra.mxu0 %v197_v1  ;;  %vm124_vm2 = vcmp.lt.s32.totalorder %v119_v14, 14 }
   0xa   :  { %94 = vmatpush.bf16.msra.mxu0 %v196_v2 }
   0xe   :  { %95 = vmatpush.bf16.msra.mxu0 %v195_v3 }
  0x12   :  { %96 = vmatpush.bf16.msra.mxu0 %v194_v4 }
  0x16   :  { %97 = vmatpush.bf16.msra.mxu0 %v193_v5 }
  0x1a   :  { %98 = vmatpush.bf16.msra.mxu0 %v192_v6 }
  0x1e   :  { %99 = vmatpush.bf16.msra.mxu0 %v191_v7 }
  0x21   :  { %100 = vmatmul.bf16.vlgmr.msra.gmra.mxu0 %v190_v8 }
  0x9e   :  { %v101_v11 = vpop.f32.mrf.mxu0 }
  0x9f   :  { %v102_v13 = vadd.f32 %v204_v10, %v101_v11 }
  0xa1   :  { %v108_v15 = vmul.f32 0.01, %v102_v13  ;;  %vm106_vm0 = vcmp.gt.f32.partialorder %v102_v13, 0.0 }
  0xa3   :  { %v110_v19 = vsel %vm106_vm0, %v102_v13, %v108_v15 }
  0xa4   :  { %v134_v23 = vmul.f32 %v110_v19, %v110_v19 }
  0xa6   :  { %v103_v16 = vpop.f32.mrf.mxu0 }
  0xa7   :  { %v104_v17 = vadd.f32 %v204_v10, %v103_v16 }
  0xa9   :  { %vm107_vm1 = vcmp.gt.f32.partialorder %v104_v17, 0.0  ;;  %v109_v18 = vmul.f32 0.01, %v104_v17 }
  0xab   :  { %v111_v20 = vsel %vm107_vm1, %v104_v17, %v109_v18 }
  0xac   :  { %v202_v21 = vpack.c.bf16 %v111_v20, %v110_v19  ;;  %v126_v22 = vsel %vm124_vm2, %v111_v20, 0.0 }
  0xad   :  { %v127_v24 = vadd.f32 %v126_v22, %v110_v19  ;;  %v135_v25 = vmul.f32 %v126_v22, %v111_v20 }
  0xae   :  { %203 = vst [vmem:[%s269_s3] sm:$0xff] %v202_v21  }
  0xaf   :  { %v128_v26 = vrot.slane %v127_v24, 4  ;;  %v136_v27 = vadd.f32 %v135_v25, %v134_v23 }
  0xb1   :  { %v129_v28 = vadd.f32 %v128_v26, %v127_v24  ;;  %v137_v29 = vrot.slane %v136_v27, 4 }
  0xb3   :  { %v130_v30 = vrot.slane %v129_v28, 2  ;;  %v138_v31 = vadd.f32 %v137_v29, %v136_v27 }
  0xb5   :  { %v131_v32 = vadd.f32 %v130_v30, %v129_v28  ;;  %v139_v33 = vrot.slane %v138_v31, 2 }
  0xb7   :  { %v132_v34 = vrot.slane %v131_v32, 1  ;;  %v140_v35 = vadd.f32 %v139_v33, %v138_v31 }
  0xb9   :  { %v141_v36 = vrot.slane %v140_v35, 1  ;;  %v133_v37 = vadd.f32 %v132_v34, %v131_v32 }
  0xbb   :  { %v142_v38 = vadd.f32 %v141_v36, %v140_v35 }
  0xbd   :  { %v144_v39 = vsel %vm143_vm3, %v133_v37, %v142_v38 }
  0xbe   :  { %145 = vst [vmem:[%s270_s4] sm:$0x3] %v144_v39 }

// kernel: _forward_impl.6
= control target key start
LH: loop header
LB: loop body
LE: loop exit
PB: predicated region body
PF: predicated region fallthrough
CT: control target
= control target key end

     0   :  { %vm144_vm0 = vcmask 1041408   ;;  %vm145_vm1 = vcmask 1042432   ;;  %v304_v2 = vmov 65535   ;;  %vm140_vm2 = vcmask 695296   ;;  %s393_s1 = inlined_call_operand.vmem [shape: bf16[213,128], index: 1, kind: input, shape index: {}]   ;;  %s394_s0 = inlined_call_operand.vmem [shape: bf16[16,213], index: 0, kind: input, shape index: {}]   ;;  %s395_s2 = inlined_call_operand.vmem [shape: f32[1,128], index: 2, kind: input, shape index: {}]   ;;  %s396_s3 = inlined_call_operand.vmem [shape: bf16[16,128], index: 3, kind: output, shape index: {0}]   ;;  %s397_s4 = inlined_call_operand.vmem [shape: f32[1,2,128], index: 4, kind: output, shape index: {1}]  }
   0x1   :  { %v291_v0 = vld [vmem:[%s393_s1 + $0x38] sm:$0xff]  ;;  %v45_v1 = vld [vmem:[%s393_s1 + $0x68] sm:$0x7]  ;;  %v146_v3 = vsel %vm144_vm0, 4294967295, %v304_v2  ;;  %v290_v5 = vld [vmem:[%s393_s1 + $0x30] sm:$0xff]  ;;  %v184_v26 = vlaneseq  ;;  %vm210_vm4 = vcmask 1040384  }
   0x2   :  { %v112_v4 = vunpack.c.l.b16 %v45_v1  ;;  %151 = vmatpush.bf16.msra.mxu0 %v291_v0  ;;  %v147_v6 = vsel %vm145_vm1, %v146_v3, 0  ;;  %v289_v9 = vld [vmem:[%s393_s1 + $0x28] sm:$0xff]  ;;  %v296_v10 = vld [vmem:[%s393_s1 + $0x60] sm:$0xff]  ;;  %v295_v12 = vld [vmem:[%s393_s1 + $0x58] sm:$0xff] }
   0x3   :  { %v288_v11 = vld [vmem:[%s393_s1 + $0x20] sm:$0xff]  ;;  %v287_v13 = vld [vmem:[%s393_s1 + $0x18] sm:$0xff]  ;;  %v294_v14 = vld [vmem:[%s393_s1 + $0x50] sm:$0xff]  ;;  %v185_v30 = vshrl.u32 %v184_v26, 7 }
   0x4   :  { %v126_v7 = vpack.c.b16 %v112_v4, %v112_v4  ;;  %v286_v15 = vld [vmem:[%s393_s1 + $0x10] sm:$0xff]  ;;  %v293_v16 = vld [vmem:[%s393_s1 + $0x48] sm:$0xff]  ;;  %v292_v18 = vld [vmem:[%s393_s1 + $0x40] sm:$0xff] }
   0x5   :  { %v285_v17 = vld [vmem:[%s393_s1 + $0x8] sm:$0xff]  ;;  %v282_v19 = vld [vmem:[%s394_s0 + $0x4] sm:$0xf]  ;;  %v223_v23 = vld [vmem:[%s394_s0] sm:$0xf]  ;;  %v186_v32 = vadd.s32 8, %v185_v30 }
   0x6   :  { %v149_v8 = vand.u32 %v147_v6, %v126_v7  ;;  %152 = vmatpush.bf16.msra.mxu0 %v290_v5  ;;  %v225_v20 = vld [vmem:[%s394_s0 + $0x8] sm:$0xf0]  ;;  %v284_v22 = vld [vmem:[%s393_s1] sm:$0xff]  ;;  %v283_v24 = vld [vmem:[%s394_s0 + $0x4] sm:$0xf0] }
   0x7   :  { %v228_v21 = vor.u32 %v282_v19, %v225_v20  ;;  %v224_v25 = vor.u32 %v283_v24, %v223_v23  ;;  %v303_v29 = vld [vmem:[%s395_s2] ss:$0 sm:$0xff]  ;;  %vm191_vm3 = vcmp.lt.s32.totalorder %v186_v32, 14 }
   0x8   :  { %167 = vmatpush.bf16.msra.mxu1 %v149_v8 }
   0xa   :  { %153 = vmatpush.bf16.msra.mxu0 %v289_v9 }
   0xc   :  { %168 = vmatpush.bf16.msra.mxu1 %v296_v10 }
   0xe   :  { %154 = vmatpush.bf16.msra.mxu0 %v288_v11 }
  0x10   :  { %169 = vmatpush.bf16.msra.mxu1 %v295_v12 }
  0x12   :  { %155 = vmatpush.bf16.msra.mxu0 %v287_v13 }
  0x14   :  { %170 = vmatpush.bf16.msra.mxu1 %v294_v14 }
  0x16   :  { %156 = vmatpush.bf16.msra.mxu0 %v286_v15 }
  0x18   :  { %171 = vmatpush.bf16.msra.mxu1 %v293_v16 }
  0x1a   :  { %157 = vmatpush.bf16.msra.mxu0 %v285_v17 }
  0x1c   :  { %172 = vmatpush.bf16.msra.mxu1 %v292_v18 }
  0x1e   :  { %158 = vmatpush.bf16.msra.mxu0 %v284_v22 }
  0x1f   :  { %281 = vmatmul.msk.bf16.vlgmr.msra.gmra.mxu1 %vm140_vm2, %v228_v21 }
  0x21   :  { %159 = vmatmul.bf16.vlgmr.msra.gmra.mxu0 %v224_v25 }
  0x9c   :  { %v174_v27 = vpop.f32.mrf.mxu1 }
  0x9e   :  { %v160_v28 = vpop.f32.mrf.mxu0 }
  0x9f   :  { %v161_v31 = vadd.f32 %v303_v29, %v160_v28 }
  0xa1   :  { %v175_v35 = vadd.f32 %v174_v27, %v161_v31 }
  0xa3   :  { %v201_v40 = vmul.f32 %v175_v35, %v175_v35 }
  0xa4   :  { %v176_v36 = vpop.f32.mrf.mxu1 }
  0xa6   :  { %v162_v33 = vpop.f32.mrf.mxu0 }
  0xa7   :  { %v163_v34 = vadd.f32 %v303_v29, %v162_v33 }
  0xa9   :  { %v177_v37 = vadd.f32 %v176_v36, %v163_v34 }
  0xab   :  { %v300_v38 = vpack.c.bf16 %v177_v37, %v175_v35  ;;  %v193_v39 = vsel %vm191_vm3, %v177_v37, 0.0 }
  0xac   :  { %v194_v41 = vadd.f32 %v193_v39, %v175_v35  ;;  %v202_v42 = vmul.f32 %v193_v39, %v177_v37 }
  0xad   :  { %301 = vst [vmem:[%s396_s3] sm:$0xff] %v300_v38  }
  0xae   :  { %v195_v43 = vrot.slane %v194_v41, 4  ;;  %v203_v44 = vadd.f32 %v202_v42, %v201_v40 }
  0xb0   :  { %v196_v45 = vadd.f32 %v195_v43, %v194_v41  ;;  %v204_v46 = vrot.slane %v203_v44, 4 }
  0xb2   :  { %v197_v47 = vrot.slane %v196_v45, 2  ;;  %v205_v48 = vadd.f32 %v204_v46, %v203_v44 }
  0xb4   :  { %v198_v49 = vadd.f32 %v197_v47, %v196_v45  ;;  %v206_v50 = vrot.slane %v205_v48, 2 }
  0xb6   :  { %v199_v51 = vrot.slane %v198_v49, 1  ;;  %v207_v52 = vadd.f32 %v206_v50, %v205_v48 }
  0xb8   :  { %v208_v53 = vrot.slane %v207_v52, 1  ;;  %v200_v54 = vadd.f32 %v199_v51, %v198_v49 }
  0xba   :  { %v209_v55 = vadd.f32 %v208_v53, %v207_v52 }
  0xbc   :  { %v211_v56 = vsel %vm210_vm4, %v200_v54, %v209_v55 }
  0xbd   :  { %212 = vst [vmem:[%s397_s4] sm:$0x3] %v211_v56 }

// kernel: _forward_impl.10
= control target key start
LH: loop header
LB: loop body
LE: loop exit
PB: predicated region body
PF: predicated region fallthrough
CT: control target
= control target key end

     0   :  { %vm344_vm0 = vcmask 261120   ;;  %vm599_vm2 = vcmask 1040384   ;;  %s1136_s1 = inlined_call_operand.vmem [shape: bf16[416,128], index: 1, kind: input, shape index: {}]   ;;  %s1137_s0 = inlined_call_operand.vmem [shape: bf16[80,416], index: 0, kind: input, shape index: {}]   ;;  %s1138_s2 = inlined_call_operand.vmem [shape: f32[1,128], index: 2, kind: input, shape index: {}]   ;;  %s1139_s3 = inlined_call_operand.vmem [shape: bf16[80,128], index: 3, kind: output, shape index: {0}]   ;;  %s1140_s4 = inlined_call_operand.vmem [shape: f32[1,2,128], index: 4, kind: output, shape index: {1}]  }
   0x1   :  { %v826_v0 = vld [vmem:[%s1136_s1 + $0x38] sm:$0xff]  ;;  %v825_v3 = vld [vmem:[%s1136_s1 + $0x30] sm:$0xff]  ;;  %v844_v6 = vld [vmem:[%s1136_s1 + $0xc8] sm:$0xff] }
   0x2   :  { %v834_v1 = vld [vmem:[%s1136_s1 + $0x78] sm:$0xff]  ;;  %360 = vmatpush.bf16.msra.mxu0 %v826_v0  ;;  %v833_v4 = vld [vmem:[%s1136_s1 + $0x70] sm:$0xff]  ;;  %v824_v7 = vld [vmem:[%s1136_s1 + $0x28] sm:$0xff]  ;;  %468 = vmatpush.bf16.msra.mxu3 %v844_v6 }
   0x3   :  { %v842_v2 = vld [vmem:[%s1136_s1 + $0xb8] sm:$0xff]  ;;  %394 = vmatpush.bf16.msra.mxu1 %v834_v1  ;;  %v841_v5 = vld [vmem:[%s1136_s1 + $0xb0] sm:$0xff]  ;;  %v832_v8 = vld [vmem:[%s1136_s1 + $0x68] sm:$0xff] }
   0x4   :  { %428 = vmatpush.bf16.msra.mxu2 %v842_v2  ;;  %v840_v9 = vld [vmem:[%s1136_s1 + $0xa8] sm:$0xff]  ;;  %v843_v10 = vld [vmem:[%s1136_s1 + $0xc0] sm:$0xff]  ;;  %v622_v12 = vld [vmem:[%s1137_s0 + $0x18] sm:$0xf0] }
   0x5   :  { %v800_v11 = vld [vmem:[%s1137_s0 + $0xc] sm:$0xf]  ;;  %v823_v13 = vld [vmem:[%s1136_s1 + $0x20] sm:$0xff]  ;;  %v822_v17 = vld [vmem:[%s1136_s1 + $0x18] sm:$0xff] }
   0x6   :  { %361 = vmatpush.bf16.msra.mxu0 %v825_v3  ;;  %v831_v14 = vld [vmem:[%s1136_s1 + $0x60] sm:$0xff]  ;;  %469 = vmatpush.bf16.msra.mxu3 %v843_v10  ;;  %v625_v16 = vor.u32 %v800_v11, %v622_v12  ;;  %v830_v18 = vld [vmem:[%s1136_s1 + $0x58] sm:$0xff]  ;;  %v821_v20 = vld [vmem:[%s1136_s1 + $0x10] sm:$0xff] }
   0x7   :  { %395 = vmatpush.bf16.msra.mxu1 %v833_v4  ;;  %v839_v15 = vld [vmem:[%s1136_s1 + $0xa0] sm:$0xff]  ;;  %v838_v19 = vld [vmem:[%s1136_s1 + $0x98] sm:$0xff]  ;;  %v829_v21 = vld [vmem:[%s1136_s1 + $0x50] sm:$0xff] }
   0x8   :  { %429 = vmatpush.bf16.msra.mxu2 %v841_v5  ;;  %v837_v22 = vld [vmem:[%s1136_s1 + $0x90] sm:$0xff]  ;;  %v820_v23 = vld [vmem:[%s1136_s1 + $0x8] sm:$0xff]  ;;  %v638_v27 = vld [vmem:[%s1137_s0 + $0x38] sm:$0xf0] }
   0x9   :  { %794 = vmatmul.msk.bf16.vlgmr.msra.gmra.mxu3 %vm344_vm0, %v625_v16  ;;  %v828_v24 = vld [vmem:[%s1136_s1 + $0x48] sm:$0xff]  ;;  %v819_v28 = vld [vmem:[%s1136_s1] sm:$0xff]  ;;  %v801_v31 = vld [vmem:[%s1137_s0 + $0xc] sm:$0xf0] }
   0xa   :  { %362 = vmatpush.bf16.msra.mxu0 %v824_v7  ;;  %v836_v25 = vld [vmem:[%s1136_s1 + $0x88] sm:$0xff]  ;;  %v827_v29 = vld [vmem:[%s1136_s1 + $0x40] sm:$0xff]  ;;  %v614_v33 = vld [vmem:[%s1137_s0 + $0x10] sm:$0xf0] }
   0xb   :  { %396 = vmatpush.bf16.msra.mxu1 %v832_v8  ;;  %v804_v26 = vld [vmem:[%s1137_s0 + $0x2c] sm:$0xf]  ;;  %v612_v30 = vld [vmem:[%s1137_s0] sm:$0xf]  ;;  %v799_v32 = vld [vmem:[%s1137_s0 + $0x4] sm:$0xf] }
   0xc   :  { %430 = vmatpush.bf16.msra.mxu2 %v840_v9  ;;  %v835_v34 = vld [vmem:[%s1136_s1 + $0x80] sm:$0xff]  ;;  %v620_v35 = vld [vmem:[%s1137_s0 + $0x8] sm:$0xf]  ;;  %v802_v36 = vld [vmem:[%s1137_s0 + $0x14] sm:$0xf0]  ;;  %v641_v37 = vor.u32 %v804_v26, %v638_v27  ;;  %v613_v38 = vor.u32 %v801_v31, %v612_v30  ;;  %v617_v39 = vor.u32 %v799_v32, %v614_v33 }
   0xd   :  { %v621_v40 = vor.u32 %v802_v36, %v620_v35  ;;  %v808_v41 = vld [vmem:[%s1137_s0 + $0x4c] sm:$0xf]  ;;  %v654_v42 = vld [vmem:[%s1137_s0 + $0x58] sm:$0xf0]  ;;  %v628_v43 = vld [vmem:[%s1137_s0 + $0x20] sm:$0xf] }
   0xe   :  { %363 = vmatpush.bf16.msra.mxu0 %v823_v13  ;;  %v805_v44 = vld [vmem:[%s1137_s0 + $0x2c] sm:$0xf0]  ;;  %v803_v45 = vld [vmem:[%s1137_s0 + $0x24] sm:$0xf]  ;;  %v630_v46 = vld [vmem:[%s1137_s0 + $0x30] sm:$0xf0]  ;;  %v657_v49 = vor.u32 %v808_v41, %v654_v42 }
   0xf   :  { %397 = vmatpush.bf16.msra.mxu1 %v831_v14  ;;  %v636_v47 = vld [vmem:[%s1137_s0 + $0x28] sm:$0xf]  ;;  %v806_v48 = vld [vmem:[%s1137_s0 + $0x34] sm:$0xf0]  ;;  %v629_v50 = vor.u32 %v805_v44, %v628_v43  ;;  %v633_v51 = vor.u32 %v803_v45, %v630_v46  ;;  %v812_v53 = vld [vmem:[%s1137_s0 + $0x6c] sm:$0xf] }
  0x10   :  { %431 = vmatpush.bf16.msra.mxu2 %v839_v15  ;;  %v637_v52 = vor.u32 %v806_v48, %v636_v47  ;;  %v670_v54 = vld [vmem:[%s1137_s0 + $0x78] sm:$0xf0]  ;;  %v644_v55 = vld [vmem:[%s1137_s0 + $0x40] sm:$0xf]  ;;  %v809_v56 = vld [vmem:[%s1137_s0 + $0x4c] sm:$0xf0] }
  0x11   :  { %v807_v57 = vld [vmem:[%s1137_s0 + $0x44] sm:$0xf]  ;;  %v646_v58 = vld [vmem:[%s1137_s0 + $0x50] sm:$0xf0]  ;;  %v652_v59 = vld [vmem:[%s1137_s0 + $0x48] sm:$0xf]  ;;  %v673_v61 = vor.u32 %v812_v53, %v670_v54  ;;  %v645_v62 = vor.u32 %v809_v56, %v644_v55 }
  0x12   :  { %364 = vmatpush.bf16.msra.mxu0 %v822_v17  ;;  %v810_v60 = vld [vmem:[%s1137_s0 + $0x54] sm:$0xf0]  ;;  %v649_v63 = vor.u32 %v807_v57, %v646_v58  ;;  %v816_v1 = vld [vmem:[%s1137_s0 + $0x8c] sm:$0xf]  ;;  %v686_v2 = vld [vmem:[%s1137_s0 + $0x98] sm:$0xf0] }
  0x13   :  { %398 = vmatpush.bf16.msra.mxu1 %v830_v18  ;;  %v653_v0 = vor.u32 %v810_v60, %v652_v59  ;;  %v660_v3 = vld [vmem:[%s1137_s0 + $0x60] sm:$0xf]  ;;  %v813_v4 = vld [vmem:[%s1137_s0 + $0x6c] sm:$0xf0]  ;;  %v811_v5 = vld [vmem:[%s1137_s0 + $0x64] sm:$0xf]  ;;  %v689_v9 = vor.u32 %v816_v1, %v686_v2 }
  0x14   :  { %432 = vmatpush.bf16.msra.mxu2 %v838_v19  ;;  %v662_v6 = vld [vmem:[%s1137_s0 + $0x70] sm:$0xf0]  ;;  %v668_v7 = vld [vmem:[%s1137_s0 + $0x68] sm:$0xf]  ;;  %v814_v8 = vld [vmem:[%s1137_s0 + $0x74] sm:$0xf0]  ;;  %v661_v10 = vor.u32 %v813_v4, %v660_v3 }
  0x15   :  { %v665_v11 = vor.u32 %v811_v5, %v662_v6  ;;  %v669_v12 = vor.u32 %v814_v8, %v668_v7  ;;  %v676_v13 = vld [vmem:[%s1137_s0 + $0x80] sm:$0xf]  ;;  %v817_v14 = vld [vmem:[%s1137_s0 + $0x8c] sm:$0xf0]  ;;  %v815_v15 = vld [vmem:[%s1137_s0 + $0x84] sm:$0xf] }
  0x16   :  { %365 = vmatpush.bf16.msra.mxu0 %v821_v20  ;;  %v678_v16 = vld [vmem:[%s1137_s0 + $0x90] sm:$0xf0]  ;;  %v684_v17 = vld [vmem:[%s1137_s0 + $0x88] sm:$0xf]  ;;  %v818_v18 = vld [vmem:[%s1137_s0 + $0x94] sm:$0xf0]  ;;  %v677_v19 = vor.u32 %v817_v14, %v676_v13 }
  0x17   :  { %399 = vmatpush.bf16.msra.mxu1 %v829_v21  ;;  %v681_v20 = vor.u32 %v815_v15, %v678_v16  ;;  %v685_v21 = vor.u32 %v818_v18, %v684_v17  ;;  %v1106_v26 = vld [vmem:[%s1138_s2] ss:$0 sm:$0xff] }
  0x18   :  { %433 = vmatpush.bf16.msra.mxu2 %v837_v22 }
  0x19   :  { %795 = vmatmul.msk.bf16.gmra.mxu3 %vm344_vm0, %v641_v37 }
  0x1a   :  { %366 = vmatpush.bf16.msra.mxu0 %v820_v23 }
  0x1b   :  { %400 = vmatpush.bf16.msra.mxu1 %v828_v24 }
  0x1c   :  { %434 = vmatpush.bf16.msra.mxu2 %v836_v25 }
  0x1e   :  { %367 = vmatpush.bf16.msra.mxu0 %v819_v28 }
  0x1f   :  { %401 = vmatpush.bf16.msra.mxu1 %v827_v29 }
  0x20   :  { %435 = vmatpush.bf16.msra.mxu2 %v835_v34 }
  0x21   :  { %368 = vmatmul.bf16.vlgmr.msra.gmra.mxu0 %v613_v38 }
  0x22   :  { %402 = vmatmul.bf16.vlgmr.msra.gmra.mxu1 %v617_v39 }
  0x23   :  { %436 = vmatmul.bf16.vlgmr.msra.gmra.mxu2 %v621_v40 }
  0x29   :  { %796 = vmatmul.msk.bf16.gmra.mxu3 %vm344_vm0, %v657_v49 }
  0x31   :  { %373 = vmatmul.bf16.gmra.mxu0 %v629_v50 }
  0x32   :  { %407 = vmatmul.bf16.gmra.mxu1 %v633_v51 }
  0x33   :  { %441 = vmatmul.bf16.gmra.mxu2 %v637_v52 }
  0x39   :  { %797 = vmatmul.msk.bf16.gmra.mxu3 %vm344_vm0, %v673_v61 }
  0x41   :  { %378 = vmatmul.bf16.gmra.mxu0 %v645_v62 }
  0x42   :  { %412 = vmatmul.bf16.gmra.mxu1 %v649_v63 }
  0x43   :  { %446 = vmatmul.bf16.gmra.mxu2 %v653_v0 }
  0x49   :  { %798 = vmatmul.msk.bf16.gmra.mxu3 %vm344_vm0, %v689_v9 }
  0x51   :  { %383 = vmatmul.bf16.gmra.mxu0 %v661_v10 }
  0x52   :  { %417 = vmatmul.bf16.gmra.mxu1 %v665_v11 }
  0x53   :  { %451 = vmatmul.bf16.gmra.mxu2 %v669_v12 }
  0x61   :  { %388 = vmatmul.bf16.gmra.mxu0 %v677_v19 }
  0x62   :  { %422 = vmatmul.bf16.gmra.mxu1 %v681_v20  ;;  %v517_v20 = vlaneseq }
  0x63   :  { %456 = vmatmul.bf16.gmra.mxu2 %v685_v21 }
  0x8c   :  { %v471_v22 = vpop.f32.mrf.mxu3 }
  0x94   :  { %v473_v25 = vpop.f32.mrf.mxu3 }
  0x9c   :  { %v476_v33 = vpop.f32.mrf.mxu3 }
  0x9e   :  { %v369_v23 = vpop.f32.mrf.mxu0 }
  0x9f   :  { %v403_v24 = vpop.f32.mrf.mxu1  ;;  %v370_v27 = vadd.f32 %v1106_v26, %v369_v23 }
  0xa1   :  { %v404_v31 = vadd.f32 %v403_v24, %v370_v27 }
  0xa4   :  { %v478_v43 = vpop.f32.mrf.mxu3 }
  0xa6   :  { %v437_v28 = vpop.f32.mrf.mxu2  ;;  %v371_v29 = vpop.f32.mrf.mxu0 }
  0xa7   :  { %v405_v30 = vpop.f32.mrf.mxu1  ;;  %v372_v32 = vadd.f32 %v1106_v26, %v371_v29  ;;  %v438_v34 = vadd.f32 %v437_v28, %v404_v31 }
  0xa9   :  { %v406_v35 = vadd.f32 %v405_v30, %v372_v32  ;;  %v472_v40 = vadd.f32 %v471_v22, %v438_v34  ;;  %v518_v30 = vshrl.u32 %v517_v20, 7 }
  0xac   :  { %v481_v53 = vpop.f32.mrf.mxu3 }
  0xae   :  { %v439_v36 = vpop.f32.mrf.mxu2  ;;  %v374_v38 = vpop.f32.mrf.mxu0 }
  0xaf   :  { %v440_v37 = vadd.f32 %v439_v36, %v406_v35  ;;  %v408_v39 = vpop.f32.mrf.mxu1  ;;  %v375_v44 = vadd.f32 %v1106_v26, %v374_v38  ;;  %v574_v36 = vmul.f32 %v472_v40, %v472_v40 }
  0xb1   :  { %v474_v41 = vadd.f32 %v473_v25, %v440_v37  ;;  %v409_v48 = vadd.f32 %v408_v39, %v375_v44 }
  0xb3   :  { %v848_v42 = vpack.c.bf16 %v474_v41, %v472_v40  ;;  %v559_v23 = vadd.f32 %v474_v41, %v472_v40  ;;  %v575_v31 = vmul.f32 %v474_v41, %v474_v41 }
  0xb4   :  { %v483_v0 = vpop.f32.mrf.mxu3 }
  0xb5   :  { %849 = vst [vmem:[%s1139_s3] sm:$0xff] %v848_v42   ;;  %v584_v44 = vadd.f32 %v575_v31, %v574_v36 }
  0xb6   :  { %v442_v45 = vpop.f32.mrf.mxu2  ;;  %v376_v46 = vpop.f32.mrf.mxu0 }
  0xb7   :  { %v410_v47 = vpop.f32.mrf.mxu1  ;;  %v377_v49 = vadd.f32 %v1106_v26, %v376_v46  ;;  %v443_v50 = vadd.f32 %v442_v45, %v409_v48 }
  0xb9   :  { %v411_v51 = vadd.f32 %v410_v47, %v377_v49  ;;  %v477_v57 = vadd.f32 %v476_v33, %v443_v50 }
  0xbb   :  { %v560_v28 = vadd.f32 %v559_v23, %v477_v57  ;;  %v576_v37 = vmul.f32 %v477_v57, %v477_v57 }
  0xbc   :  { %v486_v11 = vpop.f32.mrf.mxu3 }
  0xbd   :  { %v585_v41 = vadd.f32 %v584_v44, %v576_v37 }
  0xbe   :  { %v444_v52 = vpop.f32.mrf.mxu2  ;;  %v379_v55 = vpop.f32.mrf.mxu0 }
  0xbf   :  { %v445_v54 = vadd.f32 %v444_v52, %v411_v51  ;;  %v413_v56 = vpop.f32.mrf.mxu1  ;;  %v380_v60 = vadd.f32 %v1106_v26, %v379_v55 }
  0xc1   :  { %v479_v58 = vadd.f32 %v478_v43, %v445_v54  ;;  %v414_v1 = vadd.f32 %v413_v56, %v380_v60  ;;  %v526_v43 = vadd.s32 64, %v518_v30 }
  0xc3   :  { %v853_v59 = vpack.c.bf16 %v479_v58, %v477_v57  ;;  %v561_v34 = vadd.f32 %v560_v28, %v479_v58  ;;  %v577_v45 = vmul.f32 %v479_v58, %v479_v58  ;;  %vm547_vm1 = vcmp.lt.s32.totalorder %v526_v43, 70 }
  0xc4   :  { %v488_v19 = vpop.f32.mrf.mxu3 }
  0xc5   :  { %870 = vst [vmem:[%s1139_s3 + $0x8] sm:$0xff] %v853_v59   ;;  %v586_v40 = vadd.f32 %v585_v41, %v577_v45 }
  0xc6   :  { %v447_v61 = vpop.f32.mrf.mxu2  ;;  %v381_v62 = vpop.f32.mrf.mxu0 }
  0xc7   :  { %v415_v63 = vpop.f32.mrf.mxu1  ;;  %v382_v2 = vadd.f32 %v1106_v26, %v381_v62  ;;  %v448_v3 = vadd.f32 %v447_v61, %v414_v1 }
  0xc9   :  { %v416_v4 = vadd.f32 %v415_v63, %v382_v2  ;;  %v482_v9 = vadd.f32 %v481_v53, %v448_v3 }
  0xcb   :  { %v562_v42 = vadd.f32 %v561_v34, %v482_v9  ;;  %v578_v49 = vmul.f32 %v482_v9, %v482_v9 }
  0xcc   :  { %v491_v47 = vpop.f32.mrf.mxu3 }
  0xcd   :  { %v587_v57 = vadd.f32 %v586_v40, %v578_v49 }
  0xce   :  { %v449_v5 = vpop.f32.mrf.mxu2  ;;  %v384_v7 = vpop.f32.mrf.mxu0 }
  0xcf   :  { %v450_v6 = vadd.f32 %v449_v5, %v416_v4  ;;  %v418_v8 = vpop.f32.mrf.mxu1  ;;  %v385_v13 = vadd.f32 %v1106_v26, %v384_v7 }
  0xd1   :  { %v484_v10 = vadd.f32 %v483_v0, %v450_v6  ;;  %v419_v17 = vadd.f32 %v418_v8, %v385_v13 }
  0xd3   :  { %v858_v12 = vpack.c.bf16 %v484_v10, %v482_v9  ;;  %v563_v46 = vadd.f32 %v562_v42, %v484_v10  ;;  %v579_v53 = vmul.f32 %v484_v10, %v484_v10 }
  0xd4   :  { %v493_v6 = vpop.f32.mrf.mxu3 }
  0xd5   :  { %871 = vst [vmem:[%s1139_s3 + $0x10] sm:$0xff] %v858_v12   ;;  %v588_v62 = vadd.f32 %v587_v57, %v579_v53 }
  0xd6   :  { %v452_v14 = vpop.f32.mrf.mxu2  ;;  %v386_v15 = vpop.f32.mrf.mxu0 }
  0xd7   :  { %v420_v16 = vpop.f32.mrf.mxu1  ;;  %v387_v18 = vadd.f32 %v1106_v26, %v386_v15  ;;  %v453_v21 = vadd.f32 %v452_v14, %v419_v17 }
  0xd9   :  { %v421_v22 = vadd.f32 %v420_v16, %v387_v18  ;;  %v487_v32 = vadd.f32 %v486_v11, %v453_v21 }
  0xdb   :  { %v564_v52 = vadd.f32 %v563_v46, %v487_v32  ;;  %v580_v58 = vmul.f32 %v487_v32, %v487_v32 }
  0xdd   :  { %v589_v3 = vadd.f32 %v588_v62, %v580_v58 }
  0xde   :  { %v454_v24 = vpop.f32.mrf.mxu2  ;;  %v389_v27 = vpop.f32.mrf.mxu0 }
  0xdf   :  { %v455_v25 = vadd.f32 %v454_v24, %v421_v22  ;;  %v390_v29 = vadd.f32 %v1106_v26, %v389_v27  ;;  %v423_v35 = vpop.f32.mrf.mxu1 }
  0xe1   :  { %v489_v33 = vadd.f32 %v488_v19, %v455_v25  ;;  %v424_v39 = vadd.f32 %v423_v35, %v390_v29 }
  0xe3   :  { %v863_v38 = vpack.c.bf16 %v489_v33, %v487_v32  ;;  %v565_v56 = vadd.f32 %v564_v52, %v489_v33  ;;  %v581_v63 = vmul.f32 %v489_v33, %v489_v33 }
  0xe5   :  { %872 = vst [vmem:[%s1139_s3 + $0x18] sm:$0xff] %v863_v38   ;;  %v590_v7 = vadd.f32 %v589_v3, %v581_v63 }
  0xe6   :  { %v457_v48 = vpop.f32.mrf.mxu2  ;;  %v391_v51 = vpop.f32.mrf.mxu0 }
  0xe7   :  { %v458_v50 = vadd.f32 %v457_v48, %v424_v39  ;;  %v392_v55 = vadd.f32 %v1106_v26, %v391_v51  ;;  %v425_v61 = vpop.f32.mrf.mxu1 }
  0xe9   :  { %v492_v54 = vadd.f32 %v491_v47, %v458_v50  ;;  %v426_v0 = vadd.f32 %v425_v61, %v392_v55 }
  0xeb   :  { %v557_v59 = vsel %vm547_vm1, %v492_v54, 0.0 }
  0xec   :  { %v566_v60 = vadd.f32 %v565_v56, %v557_v59  ;;  %v582_v4 = vmul.f32 %v557_v59, %v492_v54 }
  0xee   :  { %v568_v1 = vrot.slane %v566_v60, 4  ;;  %v459_v2 = vpop.f32.mrf.mxu2  ;;  %v591_v11 = vadd.f32 %v590_v7, %v582_v4 }
  0xef   :  { %v460_v5 = vadd.f32 %v459_v2, %v426_v0 }
  0xf0   :  { %v569_v8 = vadd.f32 %v568_v1, %v566_v60 }
  0xf1   :  { %v494_v9 = vadd.f32 %v493_v6, %v460_v5 }
  0xf2   :  { %v570_v12 = vrot.slane %v569_v8, 2 }
  0xf3   :  { %v868_v10 = vpack.c.bf16 %v494_v9, %v492_v54  ;;  %v583_v26 = vmul.f32 0.0, %v494_v9 }
  0xf4   :  { %v571_v15 = vadd.f32 %v570_v12, %v569_v8 }
  0xf5   :  { %873 = vst [vmem:[%s1139_s3 + $0x20] sm:$0xff] %v868_v10   ;;  %v592_v13 = vadd.f32 %v591_v11, %v583_v26 }
  0xf6   :  { %v572_v18 = vrot.slane %v571_v15, 1 }
  0xf7   :  { %v593_v14 = vrot.slane %v592_v13, 4 }
  0xf8   :  { %v573_v21 = vadd.f32 %v572_v18, %v571_v15 }
  0xf9   :  { %v594_v16 = vadd.f32 %v593_v14, %v592_v13 }
  0xfb   :  { %v595_v17 = vrot.slane %v594_v16, 2 }
  0xfd   :  { %v596_v19 = vadd.f32 %v595_v17, %v594_v16 }
  0xff   :  { %v597_v20 = vrot.slane %v596_v19, 1 }
 0x101   :  { %v598_v22 = vadd.f32 %v597_v20, %v596_v19 }
 0x103   :  { %v600_v23 = vsel %vm599_vm2, %v573_v21, %v598_v22 }
 0x104   :  { %601 = vst [vmem:[%s1140_s4] sm:$0x3] %v600_v23 }

// kernel: _forward_impl.11
= control target key start
LH: loop header
LB: loop body
LE: loop exit
PB: predicated region body
PF: predicated region fallthrough
CT: control target
= control target key end

     0   :  { %s352_s1 = inlined_call_operand.vmem [shape: bf16[128,128], index: 1, kind: input, shape index: {}]   ;;  %s353_s2 = inlined_call_operand.vmem [shape: f32[1,128], index: 2, kind: input, shape index: {}]   ;;  %s354_s0 = inlined_call_operand.vmem [shape: bf16[80,128], index: 0, kind: input, shape index: {}]   ;;  %s355_s3 = inlined_call_operand.vmem [shape: f32[80,128], index: 3, kind: output, shape index: {}]  }
   0x1   :  { %v234_v0 = vld [vmem:[%s352_s1 + $0x38] sm:$0xff]  ;;  %v233_v1 = vld [vmem:[%s352_s1 + $0x30] sm:$0xff]  ;;  %v232_v2 = vld [vmem:[%s352_s1 + $0x28] sm:$0xff] }
   0x2   :  { %237 = vmatpush.bf16.msra.mxu3 %v234_v0  ;;  %236 = vmatpush.bf16.msra.mxu2 %v234_v0  ;;  %v231_v3 = vld [vmem:[%s352_s1 + $0x20] sm:$0xff]  ;;  %v230_v4 = vld [vmem:[%s352_s1 + $0x18] sm:$0xff]  ;;  %v229_v5 = vld [vmem:[%s352_s1 + $0x10] sm:$0xff] }
   0x3   :  { %122 = vmatpush.bf16.msra.mxu0 %v234_v0  ;;  %235 = vmatpush.bf16.msra.mxu1 %v234_v0  ;;  %v228_v6 = vld [vmem:[%s352_s1 + $0x8] sm:$0xff]  ;;  %v227_v7 = vld [vmem:[%s352_s1] sm:$0xff]  ;;  %v225_v8 = vld [vmem:[%s354_s0 + $0x18] sm:$0xff] }
   0x4   :  { %v224_v9 = vld [vmem:[%s354_s0 + $0x10] sm:$0xff]  ;;  %v222_v10 = vld [vmem:[%s354_s0] sm:$0xff]  ;;  %v223_v11 = vld [vmem:[%s354_s0 + $0x8] sm:$0xff] }
   0x5   :  { %v226_v12 = vld [vmem:[%s354_s0 + $0x20] sm:$0xff] }
   0x6   :  { %240 = vmatpush.bf16.msra.mxu3 %v233_v1  ;;  %239 = vmatpush.bf16.msra.mxu2 %v233_v1  ;;  %v259_v13 = vld [vmem:[%s353_s2] ss:$0 sm:$0xff] }
   0x7   :  { %123 = vmatpush.bf16.msra.mxu0 %v233_v1  ;;  %238 = vmatpush.bf16.msra.mxu1 %v233_v1 }
   0xa   :  { %243 = vmatpush.bf16.msra.mxu3 %v232_v2  ;;  %242 = vmatpush.bf16.msra.mxu2 %v232_v2 }
   0xb   :  { %124 = vmatpush.bf16.msra.mxu0 %v232_v2  ;;  %241 = vmatpush.bf16.msra.mxu1 %v232_v2 }
   0xe   :  { %246 = vmatpush.bf16.msra.mxu3 %v231_v3  ;;  %245 = vmatpush.bf16.msra.mxu2 %v231_v3 }
   0xf   :  { %125 = vmatpush.bf16.msra.mxu0 %v231_v3  ;;  %244 = vmatpush.bf16.msra.mxu1 %v231_v3 }
  0x12   :  { %249 = vmatpush.bf16.msra.mxu3 %v230_v4  ;;  %248 = vmatpush.bf16.msra.mxu2 %v230_v4 }
  0x13   :  { %126 = vmatpush.bf16.msra.mxu0 %v230_v4  ;;  %247 = vmatpush.bf16.msra.mxu1 %v230_v4 }
  0x16   :  { %252 = vmatpush.bf16.msra.mxu3 %v229_v5  ;;  %251 = vmatpush.bf16.msra.mxu2 %v229_v5 }
  0x17   :  { %127 = vmatpush.bf16.msra.mxu0 %v229_v5  ;;  %250 = vmatpush.bf16.msra.mxu1 %v229_v5 }
  0x1a   :  { %255 = vmatpush.bf16.msra.mxu3 %v228_v6  ;;  %254 = vmatpush.bf16.msra.mxu2 %v228_v6 }
  0x1b   :  { %128 = vmatpush.bf16.msra.mxu0 %v228_v6  ;;  %253 = vmatpush.bf16.msra.mxu1 %v228_v6 }
  0x1e   :  { %258 = vmatpush.bf16.msra.mxu3 %v227_v7  ;;  %257 = vmatpush.bf16.msra.mxu2 %v227_v7 }
  0x1f   :  { %129 = vmatpush.bf16.msra.mxu0 %v227_v7  ;;  %256 = vmatpush.bf16.msra.mxu1 %v227_v7 }
  0x21   :  { %145 = vmatmul.bf16.vlgmr.msra.gmra.mxu3 %v225_v8  ;;  %140 = vmatmul.bf16.vlgmr.msra.gmra.mxu2 %v224_v9 }
  0x22   :  { %130 = vmatmul.bf16.vlgmr.msra.gmra.mxu0 %v222_v10  ;;  %135 = vmatmul.bf16.vlgmr.msra.gmra.mxu1 %v223_v11 }
  0x31   :  { %150 = vmatmul.bf16.gmra.mxu3 %v226_v12 }
  0x9f   :  { %v131_v14 = vpop.f32.mrf.mxu0  ;;  %v136_v15 = vpop.f32.mrf.mxu1 }
  0xa0   :  { %v132_v16 = vadd.f32 %v259_v13, %v131_v14  ;;  %v137_v17 = vadd.f32 %v259_v13, %v136_v15 }
  0xa2   :  { %156 = vst [vmem:[%s355_s3] sm:$0xff] %v132_v16 }
  0xa3   :  { %158 = vst [vmem:[%s355_s3 + $0x10] sm:$0xff] %v137_v17 }
  0xa4   :  { %v146_v18 = vpop.f32.mrf.mxu3  ;;  %v141_v19 = vpop.f32.mrf.mxu2 }
  0xa5   :  { %v147_v20 = vadd.f32 %v259_v13, %v146_v18  ;;  %v142_v21 = vadd.f32 %v259_v13, %v141_v19 }
  0xa7   :  { %162 = vst [vmem:[%s355_s3 + $0x30] sm:$0xff] %v147_v20  ;;  %v133_v22 = vpop.f32.mrf.mxu0  ;;  %v138_v23 = vpop.f32.mrf.mxu1 }
  0xa8   :  { %160 = vst [vmem:[%s355_s3 + $0x20] sm:$0xff] %v142_v21  ;;  %v134_v24 = vadd.f32 %v259_v13, %v133_v22  ;;  %v139_v25 = vadd.f32 %v259_v13, %v138_v23 }
  0xaa   :  { %157 = vst [vmem:[%s355_s3 + $0x8] sm:$0xff] %v134_v24 }
  0xab   :  { %159 = vst [vmem:[%s355_s3 + $0x18] sm:$0xff] %v139_v25 }
  0xac   :  { %v148_v26 = vpop.f32.mrf.mxu3  ;;  %v143_v27 = vpop.f32.mrf.mxu2 }
  0xad   :  { %v149_v28 = vadd.f32 %v259_v13, %v148_v26  ;;  %v144_v29 = vadd.f32 %v259_v13, %v143_v27 }
  0xaf   :  { %163 = vst [vmem:[%s355_s3 + $0x38] sm:$0xff] %v149_v28 }
  0xb0   :  { %161 = vst [vmem:[%s355_s3 + $0x28] sm:$0xff] %v144_v29 }
  0xb4   :  { %v151_v30 = vpop.f32.mrf.mxu3 }
  0xb5   :  { %v152_v31 = vadd.f32 %v259_v13, %v151_v30 }
  0xb7   :  { %164 = vst [vmem:[%s355_s3 + $0x40] sm:$0xff] %v152_v31 }
  0xbc   :  { %v153_v32 = vpop.f32.mrf.mxu3 }
  0xbd   :  { %v154_v33 = vadd.f32 %v259_v13, %v153_v32 }
  0xbf   :  { %165 = vst [vmem:[%s355_s3 + $0x48] sm:$0xff] %v154_v33 }

</bundles_post_ra>
